<compile_context>
chip_gen: v7x
topology: tpu7x:2x2x1
jax: 0.10.0
libtpu: 0.0.40
codegen_flags: <defaults>
</compile_context>

<pallas_src>
import functools

import jax
import jax.numpy as jnp
from jax.experimental import pallas as pl
from jax.experimental.pallas import tpu as pltpu


def _tanh_clamped(x, clamp=15.0):
    # torch: x.clamp(-15, 15).tanh()
    return jnp.tanh(jnp.clip(x, -clamp, clamp))


def _recip(d):
    # EUP approximate reciprocal refined with two Newton steps (~f32 accuracy).
    # Every call site is a (TM, 1) per-row column, so the refinement is negligible
    # while the expensive part runs in the otherwise-idle EUP slot, not the VALU.
    r = pl.reciprocal(d, approx=True)
    r = r * (2.0 - d * r)
    r = r * (2.0 - d * r)
    return r


def _artanh_fast(x):
    # Single-log form (1 log instead of 2): 0.5*log((1+x)/(1-x)); same clamp as torch.
    x = jnp.clip(x, -1.0 + 1e-05, 1.0 - 1e-05)
    return 0.5 * jnp.log((1.0 + x) * _recip(1.0 - x))


def _bdl_kernel(x_ref, wt_ref, o_ref, *, curvature):
    sqrt_c = curvature ** 0.5

    x = x_ref[...].astype(jnp.float32)   # (TM, Dp)
    wt = wt_ref[...]                     # (Dp, Dp) == block_diag(W).T (f32 or bf16)

    # ---- expmap0 (Poincare ball) ----
    sumsq_x = jnp.sum(x * x, axis=-1, keepdims=True)
    xnorm_raw = jnp.sqrt(sumsq_x)                      # ||x|| (unclamped)
    u_norm = jnp.maximum(xnorm_raw, 1e-05)
    sc_un = sqrt_c * u_norm
    scale1 = _tanh_clamped(sc_un) * _recip(sc_un)      # (TM, 1) per-row scale
    y = x * scale1

    # ||y|| reused algebraically: ||y|| = scale1 * ||x|| (no second reduction).
    x_norm = jnp.maximum(scale1 * xnorm_raw, 1e-05)

    # ---- mobius_matvec (block-diagonal weight, dense on the MXU) ----
    if wt.dtype == jnp.float32:
        mx = jnp.dot(y, wt, preferred_element_type=jnp.float32)
    else:
        mx = jnp.dot(y.astype(wt.dtype), wt, preferred_element_type=jnp.float32)
    sumsq_mx = jnp.sum(mx * mx, axis=-1, keepdims=True)
    mx_norm = jnp.sqrt(sumsq_mx)
    mx_norm_safe = jnp.maximum(mx_norm, 1e-15)          # avoid 0-div before masking
    # all(mx == 0) <=> sumsq == 0.  (If denormal squares underflow to 0 the row
    # returns 0, which is benign/better than the reference, which NaNs there.)
    is_zero = mx_norm == 0.0

    t2 = _tanh_clamped(mx_norm * _recip(x_norm) * _artanh_fast(sqrt_c * x_norm))
    coef = jnp.where(is_zero, 0.0, t2 * _recip(mx_norm_safe * sqrt_c))   # (TM, 1)
    res = mx * coef                                     # (TM, Dp)

    # ---- _project ----
    # ||res|| == t2 / sqrt_c (mx/||mx|| has unit norm, t2 >= 0); zero rows -> 0.
    norm = jnp.maximum(jnp.where(is_zero, 0.0, t2 * (1.0 / sqrt_c)), 1e-05)
    maxnorm = (1.0 - 0.001) / sqrt_c
    proj_scale = jnp.where(norm > maxnorm, maxnorm * _recip(norm), 1.0)
    res = res * proj_scale

    # ---- logmap0 (Poincare ball) ----
    y_norm = jnp.minimum(norm, maxnorm)                 # = max(||projected res||, 1e-5)
    out = res * (_artanh_fast(sqrt_c * y_norm) * _recip(y_norm * sqrt_c))

    o_ref[...] = out.astype(o_ref.dtype)


def block_diagonal_linear_text(x, weights, curvature=0.01, tile_m=None):
    """x: (..., D) with D == out_features. weights: (r, block_size, block_size)."""
    orig_shape = x.shape
    D = orig_shape[-1]
    r, bs, _ = weights.shape
    assert r * bs == D, "out_features must equal r * block_size"

    # Lane-dense feature dim.  D % 128 == 0 (common case) -> zero-copy pass-through.
    Dp = max(((D + 127) // 128) * 128, 128)
    needs_dpad = Dp != D

    # Dense block-diagonal weight, pre-transposed once in the wrapper (one-time XLA
    # ops, not repeated per grid step).  bf16 when Dp is large: 2x MXU rate on
    # v6e/v7x and half the VMEM/HBM footprint; at small Dp stay exact in f32.
    # TODO(synk): for very large D (>= ~2048) exploit the block-diagonal structure
    # (per-block-group K-tiled contraction) instead of a dense (Dp, Dp) weight.
    A = jax.scipy.linalg.block_diag(*[weights[i] for i in range(r)])
    A_t = jnp.asarray(A, jnp.float32).T
    if needs_dpad:
        A_t = jnp.zeros((Dp, Dp), jnp.float32).at[:D, :D].set(A_t)
    w_dtype = jnp.bfloat16 if Dp >= 512 else jnp.float32
    A_t = A_t.astype(w_dtype)

    x2d = x.reshape(-1, D)
    M = x2d.shape[0]
    if needs_dpad:
        x_in = jnp.zeros((M, Dp), x.dtype).at[:, :D].set(x2d)   # column pad only
    else:
        x_in = x2d                                              # no extra HBM copy

    x_itemsize = jnp.dtype(x.dtype).itemsize
    w_itemsize = jnp.dtype(w_dtype).itemsize

    def _vmem_bytes(t):
        io = 2 * t * Dp * x_itemsize        # double-buffered input tile
        io += 2 * t * Dp * x_itemsize       # double-buffered output tile
        wgt = Dp * Dp * w_itemsize          # grid-invariant weight, single-buffered
        tmp = 5 * t * Dp * 4                # in-kernel f32 temporaries (x, y, mx, res, out)
        return io + wgt + tmp + (1 << 20)   # slack

    try:
        vmem_cap = int(pltpu.get_tpu_info().vmem_capacity_bytes)
    except Exception:
        vmem_cap = 64 << 20                 # conservative: v7x per-TensorCore VMEM

    budget = min((vmem_cap * 7) // 10, 48 << 20)

    # Row tiling: big tiles amortize the ~0.35us/step overhead; never pad tiny
    # inputs past the next multiple of 8; keep >= 2 grid steps so both v7x
    # TensorCores get work; stay inside the per-generation VMEM budget.
    if tile_m is None:
        tile_m = 1024 if Dp <= 512 else 256
    tm = max(8, min(int(tile_m), ((M + 7) // 8) * 8))
    if M > 8:
        tm = min(tm, max(8, ((((M + 1) // 2) + 7) // 8) * 8))
    while tm > 8 and _vmem_bytes(tm) > budget:
        tm //= 2
    tm = max(8, (tm // 8) * 8)

    num_steps = (M + tm - 1) // tm          # ragged tail: Pallas masks the edge block
    vmem_limit = int(min(max(_vmem_bytes(tm), 32 << 20), vmem_cap - (4 << 20)))

    kernel = functools.partial(_bdl_kernel, curvature=curvature)

    def _call(weight_spec):
        return pl.pallas_call(
            kernel,
            out_shape=jax.ShapeDtypeStruct((M, Dp), x.dtype),
            grid_spec=pltpu.PrefetchScalarGridSpec(
                num_scalar_prefetch=0,
                grid=(num_steps,),
                in_specs=[
                    pl.BlockSpec((tm, Dp), lambda i: (i, 0)),
                    weight_spec,
                ],
                out_specs=pl.BlockSpec((tm, Dp), lambda i: (i, 0)),
            ),
            compiler_params=pltpu.CompilerParams(
                dimension_semantics=("parallel",),
                vmem_limit_bytes=vmem_limit,
            ),
        )(x_in, A_t)

    try:
        # Grid-invariant weight: constant index map + single buffer (fetched once).
        out = _call(pl.BlockSpec((Dp, Dp), lambda i: (0, 0),
                                 pipeline_mode=pl.Buffered(1)))
    except Exception:
        # Fallback if single-buffered pipeline_mode is unsupported in this jax build.
        out = _call(pl.BlockSpec((Dp, Dp), lambda i: (0, 0)))

    if needs_dpad:
        out = out[:, :D]
    return out.reshape(orig_shape)


def _reference(x, weights, curvature=0.01):
    """Pure-JAX reference mirroring the PyTorch forward."""
    def artanh(v):
        v = jnp.clip(v, -1.0 + 1e-05, 1.0 - 1e-05)
        return 0.5 * (jnp.log(1.0 + v) - jnp.log(1.0 - v))

    sqrt_c = curvature ** 0.5
    r = weights.shape[0]
    A = jax.scipy.linalg.block_diag(*[weights[i] for i in range(r)]).astype(x.dtype)

    u_norm = jnp.maximum(jnp.linalg.norm(x, axis=-1, keepdims=True), 1e-05)
    y = _tanh_clamped(sqrt_c * u_norm) * x / (sqrt_c * u_norm)

    x_norm = jnp.maximum(jnp.linalg.norm(y, axis=-1, keepdims=True), 1e-05)
    mx = y @ A.T
    mx_norm = jnp.linalg.norm(mx, axis=-1, keepdims=True)
    res_c = _tanh_clamped(mx_norm / x_norm * artanh(sqrt_c * x_norm)) * mx / (mx_norm * sqrt_c)
    cond = jnp.all(mx == 0.0, axis=-1, keepdims=True)
    res = jnp.where(cond, 0.0, res_c)

    norm = jnp.maximum(jnp.linalg.norm(res, axis=-1, keepdims=True), 1e-05)
    maxnorm = (1.0 - 0.001) / sqrt_c
    res = jnp.where(norm > maxnorm, res / norm * maxnorm, res)

    y_norm = jnp.maximum(jnp.linalg.norm(res, axis=-1, keepdims=True), 1e-05)
    return res / y_norm / sqrt_c * artanh(sqrt_c * y_norm)


if __name__ == "__main__":
    curvature = 0.01
    key = jax.random.PRNGKey(0)
    k0, k1, k2, k3 = jax.random.split(key, 4)

    def _run_case(x, weights, atol, rtol):
        out = jax.block_until_ready(
            block_diagonal_linear_text(x, weights, curvature=curvature))
        ref = _reference(x, weights, curvature=curvature)
        assert out.shape == x.shape
        assert jnp.allclose(out, ref, atol=atol, rtol=rtol), "mismatch vs reference"
        return out

    def _identity_weights(r, bs):
        # Module __init__: weights = stack of r identity matrices of size block_size.
        return jnp.stack([jnp.eye(bs, dtype=jnp.float32) for _ in range(r)])

    # Primary config from the module: block_size=8, out_features=32 (r=4),
    # input (batch=2, seq=8, hidden=32).
    x_main = jax.random.normal(k0, (2, 8, 32), dtype=jnp.float32)
    _run_case(x_main, _identity_weights(4, 8), atol=1e-5, rtol=1e-5)

    # Ragged row count (M=15 -> masked partial last tile) with the padded-D path.
    x_ragged = jax.random.normal(k1, (3, 5, 32), dtype=jnp.float32)
    _run_case(x_ragged, _identity_weights(4, 8), atol=1e-5, rtol=1e-5)

    # Lane-aligned hidden size (D=128): exercises the zero-copy (no-pad) path.
    x_aligned = jax.random.normal(k2, (2, 4, 128), dtype=jnp.float32)
    _run_case(x_aligned, _identity_weights(16, 8), atol=1e-5, rtol=1e-5)

    # Non-trivial block weights (structure/transpose check).  Loose tolerance only
    # because the XLA reference matmul and the Mosaic MXU may use different f32
    # precision modes; structural bugs would produce O(1) errors and still fail.
    w_rand = 0.5 * jax.random.normal(k3, (4, 8, 8), dtype=jnp.float32)
    _run_case(x_main, w_rand, atol=2e-2, rtol=2e-2)

    print("KERNEL_OK")
</pallas_src>

<mosaic_0001>
module attributes {stable_mosaic.version = 11 : i64} {
  func.func @_bdl_kernel(%arg0: i32, %arg1: memref<8x128xf32, #tpu.memory_space<vmem>>, %arg2: memref<128x128xf32, #tpu.memory_space<vmem>>, %arg3: memref<8x128xf32, #tpu.memory_space<vmem>>) attributes {dimension_semantics = [#tpu.dimension_semantics<parallel>], iteration_bounds = array<i64: 2>, scalar_prefetch = 0 : i64, scratch_operands = 0 : i64, tpu.core_type = #tpu.core_type<tc>, window_params = [{transform_indices = @transform_0, window_bounds = array<i64: 8, 128>}, {pipeline_mode = #tpu.pipeline_mode<synchronous>, transform_indices = @transform_1, window_bounds = array<i64: 128, 128>}, {transform_indices = @transform_2, window_bounds = array<i64: 8, 128>}]} {
    %c0 = arith.constant 0 : index
    %c0_0 = arith.constant 0 : index
    %0 = vector.load %arg1[%c0, %c0_0] : memref<8x128xf32, #tpu.memory_space<vmem>>, vector<8x128xf32>
    %c0_1 = arith.constant 0 : index
    %c0_2 = arith.constant 0 : index
    %1 = vector.load %arg2[%c0_1, %c0_2] : memref<128x128xf32, #tpu.memory_space<vmem>>, vector<128x128xf32>
    %2 = arith.mulf %0, %0 : vector<8x128xf32>
    %cst = arith.constant dense<0.000000e+00> : vector<8xf32>
    %3 = vector.multi_reduction <add>, %2, %cst [1] : vector<8x128xf32> to vector<8xf32>
    %4 = vector.shape_cast %3 : vector<8xf32> to vector<8x1xf32>
    %5 = math.sqrt %4 : vector<8x1xf32>
    %cst_3 = arith.constant 9.99999974E-6 : f32
    %6 = vector.broadcast %cst_3 : f32 to vector<8x1xf32>
    %7 = arith.maximumf %5, %6 : vector<8x1xf32>
    %cst_4 = arith.constant 1.000000e-01 : f32
    %8 = vector.broadcast %cst_4 : f32 to vector<8x1xf32>
    %9 = arith.mulf %8, %7 : vector<8x1xf32>
    %cst_5 = arith.constant -1.500000e+01 : f32
    %cst_6 = arith.constant 1.500000e+01 : f32
    %10 = vector.broadcast %cst_5 : f32 to vector<8x1xf32>
    %11 = arith.maximumf %10, %9 : vector<8x1xf32>
    %12 = vector.broadcast %cst_6 : f32 to vector<8x1xf32>
    %13 = arith.minimumf %12, %11 : vector<8x1xf32>
    %14 = math.tanh %13 : vector<8x1xf32>
    %15 = tpu.reciprocal %9 {approx = true} : vector<8x1xf32> -> vector<8x1xf32>
    %16 = arith.mulf %9, %15 : vector<8x1xf32>
    %cst_7 = arith.constant 2.000000e+00 : f32
    %17 = vector.broadcast %cst_7 : f32 to vector<8x1xf32>
    %18 = arith.subf %17, %16 : vector<8x1xf32>
    %19 = arith.mulf %15, %18 : vector<8x1xf32>
    %20 = arith.mulf %9, %19 : vector<8x1xf32>
    %cst_8 = arith.constant 2.000000e+00 : f32
    %21 = vector.broadcast %cst_8 : f32 to vector<8x1xf32>
    %22 = arith.subf %21, %20 : vector<8x1xf32>
    %23 = arith.mulf %19, %22 : vector<8x1xf32>
    %24 = arith.mulf %14, %23 : vector<8x1xf32>
    %25 = vector.broadcast %24 : vector<8x1xf32> to vector<8x128xf32>
    %26 = arith.mulf %0, %25 : vector<8x128xf32>
    %27 = arith.mulf %24, %5 : vector<8x1xf32>
    %cst_9 = arith.constant 9.99999974E-6 : f32
    %28 = vector.broadcast %cst_9 : f32 to vector<8x1xf32>
    %29 = arith.maximumf %27, %28 : vector<8x1xf32>
    %cst_10 = arith.constant dense<0.000000e+00> : vector<8x128xf32>
    %30 = tpu.matmul %26, %1, %cst_10 {dimension_numbers = #tpu.dot_dimension_numbers<[1], [0], [0], [1], [0, 0, 1, 1], [], []>} : vector<8x128xf32>, vector<128x128xf32>, vector<8x128xf32> -> vector<8x128xf32>
    %31 = arith.mulf %30, %30 : vector<8x128xf32>
    %cst_11 = arith.constant dense<0.000000e+00> : vector<8xf32>
    %32 = vector.multi_reduction <add>, %31, %cst_11 [1] : vector<8x128xf32> to vector<8xf32>
    %33 = vector.shape_cast %32 : vector<8xf32> to vector<8x1xf32>
    %34 = math.sqrt %33 : vector<8x1xf32>
    %cst_12 = arith.constant 1.000000e-15 : f32
    %35 = vector.broadcast %cst_12 : f32 to vector<8x1xf32>
    %36 = arith.maximumf %34, %35 : vector<8x1xf32>
    %cst_13 = arith.constant 0.000000e+00 : f32
    %37 = vector.broadcast %cst_13 : f32 to vector<8x1xf32>
    %38 = arith.cmpf oeq, %34, %37 : vector<8x1xf32>
    %39 = tpu.reciprocal %29 {approx = true} : vector<8x1xf32> -> vector<8x1xf32>
    %40 = arith.mulf %29, %39 : vector<8x1xf32>
    %cst_14 = arith.constant 2.000000e+00 : f32
    %41 = vector.broadcast %cst_14 : f32 to vector<8x1xf32>
    %42 = arith.subf %41, %40 : vector<8x1xf32>
    %43 = arith.mulf %39, %42 : vector<8x1xf32>
    %44 = arith.mulf %29, %43 : vector<8x1xf32>
    %cst_15 = arith.constant 2.000000e+00 : f32
    %45 = vector.broadcast %cst_15 : f32 to vector<8x1xf32>
    %46 = arith.subf %45, %44 : vector<8x1xf32>
    %47 = arith.mulf %43, %46 : vector<8x1xf32>
    %48 = arith.mulf %34, %47 : vector<8x1xf32>
    %cst_16 = arith.constant 1.000000e-01 : f32
    %49 = vector.broadcast %cst_16 : f32 to vector<8x1xf32>
    %50 = arith.mulf %49, %29 : vector<8x1xf32>
    %cst_17 = arith.constant -0.999989986 : f32
    %cst_18 = arith.constant 0.999989986 : f32
    %51 = vector.broadcast %cst_17 : f32 to vector<8x1xf32>
    %52 = arith.maximumf %51, %50 : vector<8x1xf32>
    %53 = vector.broadcast %cst_18 : f32 to vector<8x1xf32>
    %54 = arith.minimumf %53, %52 : vector<8x1xf32>
    %cst_19 = arith.constant 1.000000e+00 : f32
    %55 = vector.broadcast %cst_19 : f32 to vector<8x1xf32>
    %56 = arith.addf %55, %54 : vector<8x1xf32>
    %cst_20 = arith.constant 1.000000e+00 : f32
    %57 = vector.broadcast %cst_20 : f32 to vector<8x1xf32>
    %58 = arith.subf %57, %54 : vector<8x1xf32>
    %59 = tpu.reciprocal %58 {approx = true} : vector<8x1xf32> -> vector<8x1xf32>
    %60 = arith.mulf %58, %59 : vector<8x1xf32>
    %cst_21 = arith.constant 2.000000e+00 : f32
    %61 = vector.broadcast %cst_21 : f32 to vector<8x1xf32>
    %62 = arith.subf %61, %60 : vector<8x1xf32>
    %63 = arith.mulf %59, %62 : vector<8x1xf32>
    %64 = arith.mulf %58, %63 : vector<8x1xf32>
    %cst_22 = arith.constant 2.000000e+00 : f32
    %65 = vector.broadcast %cst_22 : f32 to vector<8x1xf32>
    %66 = arith.subf %65, %64 : vector<8x1xf32>
    %67 = arith.mulf %63, %66 : vector<8x1xf32>
    %68 = arith.mulf %56, %67 : vector<8x1xf32>
    %69 = math.log %68 : vector<8x1xf32>
    %cst_23 = arith.constant 5.000000e-01 : f32
    %70 = vector.broadcast %cst_23 : f32 to vector<8x1xf32>
    %71 = arith.mulf %70, %69 : vector<8x1xf32>
    %72 = arith.mulf %48, %71 : vector<8x1xf32>
    %cst_24 = arith.constant -1.500000e+01 : f32
    %cst_25 = arith.constant 1.500000e+01 : f32
    %73 = vector.broadcast %cst_24 : f32 to vector<8x1xf32>
    %74 = arith.maximumf %73, %72 : vector<8x1xf32>
    %75 = vector.broadcast %cst_25 : f32 to vector<8x1xf32>
    %76 = arith.minimumf %75, %74 : vector<8x1xf32>
    %77 = math.tanh %76 : vector<8x1xf32>
    %cst_26 = arith.constant 1.000000e-01 : f32
    %78 = vector.broadcast %cst_26 : f32 to vector<8x1xf32>
    %79 = arith.mulf %36, %78 : vector<8x1xf32>
    %80 = tpu.reciprocal %79 {approx = true} : vector<8x1xf32> -> vector<8x1xf32>
    %81 = arith.mulf %79, %80 : vector<8x1xf32>
    %cst_27 = arith.constant 2.000000e+00 : f32
    %82 = vector.broadcast %cst_27 : f32 to vector<8x1xf32>
    %83 = arith.subf %82, %81 : vector<8x1xf32>
    %84 = arith.mulf %80, %83 : vector<8x1xf32>
    %85 = arith.mulf %79, %84 : vector<8x1xf32>
    %cst_28 = arith.constant 2.000000e+00 : f32
    %86 = vector.broadcast %cst_28 : f32 to vector<8x1xf32>
    %87 = arith.subf %86, %85 : vector<8x1xf32>
    %88 = arith.mulf %84, %87 : vector<8x1xf32>
    %89 = arith.mulf %77, %88 : vector<8x1xf32>
    %cst_29 = arith.constant 0.000000e+00 : f32
    %90 = vector.broadcast %cst_29 : f32 to vector<8x1xf32>
    %91 = arith.select %38, %90, %89 : vector<8x1xi1>, vector<8x1xf32>
    %92 = vector.broadcast %91 : vector<8x1xf32> to vector<8x128xf32>
    %93 = arith.mulf %30, %92 : vector<8x128xf32>
    %cst_30 = arith.constant 1.000000e+01 : f32
    %94 = vector.broadcast %cst_30 : f32 to vector<8x1xf32>
    %95 = arith.mulf %77, %94 : vector<8x1xf32>
    %cst_31 = arith.constant 0.000000e+00 : f32
    %96 = vector.broadcast %cst_31 : f32 to vector<8x1xf32>
    %97 = arith.select %38, %96, %95 : vector<8x1xi1>, vector<8x1xf32>
    %cst_32 = arith.constant 9.99999974E-6 : f32
    %98 = vector.broadcast %cst_32 : f32 to vector<8x1xf32>
    %99 = arith.maximumf %97, %98 : vector<8x1xf32>
    %cst_33 = arith.constant 9.98999977 : f32
    %100 = vector.broadcast %cst_33 : f32 to vector<8x1xf32>
    %101 = arith.cmpf ogt, %99, %100 : vector<8x1xf32>
    %102 = tpu.reciprocal %99 {approx = true} : vector<8x1xf32> -> vector<8x1xf32>
    %103 = arith.mulf %99, %102 : vector<8x1xf32>
    %cst_34 = arith.constant 2.000000e+00 : f32
    %104 = vector.broadcast %cst_34 : f32 to vector<8x1xf32>
    %105 = arith.subf %104, %103 : vector<8x1xf32>
    %106 = arith.mulf %102, %105 : vector<8x1xf32>
    %107 = arith.mulf %99, %106 : vector<8x1xf32>
    %cst_35 = arith.constant 2.000000e+00 : f32
    %108 = vector.broadcast %cst_35 : f32 to vector<8x1xf32>
    %109 = arith.subf %108, %107 : vector<8x1xf32>
    %110 = arith.mulf %106, %109 : vector<8x1xf32>
    %cst_36 = arith.constant 9.98999977 : f32
    %111 = vector.broadcast %cst_36 : f32 to vector<8x1xf32>
    %112 = arith.mulf %111, %110 : vector<8x1xf32>
    %cst_37 = arith.constant 1.000000e+00 : f32
    %113 = vector.broadcast %cst_37 : f32 to vector<8x1xf32>
    %114 = arith.select %101, %112, %113 : vector<8x1xi1>, vector<8x1xf32>
    %115 = vector.broadcast %114 : vector<8x1xf32> to vector<8x128xf32>
    %116 = arith.mulf %93, %115 : vector<8x128xf32>
    %cst_38 = arith.constant 9.98999977 : f32
    %117 = vector.broadcast %cst_38 : f32 to vector<8x1xf32>
    %118 = arith.minimumf %99, %117 : vector<8x1xf32>
    %cst_39 = arith.constant 1.000000e-01 : f32
    %119 = vector.broadcast %cst_39 : f32 to vector<8x1xf32>
    %120 = arith.mulf %119, %118 : vector<8x1xf32>
    %cst_40 = arith.constant -0.999989986 : f32
    %cst_41 = arith.constant 0.999989986 : f32
    %121 = vector.broadcast %cst_40 : f32 to vector<8x1xf32>
    %122 = arith.maximumf %121, %120 : vector<8x1xf32>
    %123 = vector.broadcast %cst_41 : f32 to vector<8x1xf32>
    %124 = arith.minimumf %123, %122 : vector<8x1xf32>
    %cst_42 = arith.constant 1.000000e+00 : f32
    %125 = vector.broadcast %cst_42 : f32 to vector<8x1xf32>
    %126 = arith.addf %125, %124 : vector<8x1xf32>
    %cst_43 = arith.constant 1.000000e+00 : f32
    %127 = vector.broadcast %cst_43 : f32 to vector<8x1xf32>
    %128 = arith.subf %127, %124 : vector<8x1xf32>
    %129 = tpu.reciprocal %128 {approx = true} : vector<8x1xf32> -> vector<8x1xf32>
    %130 = arith.mulf %128, %129 : vector<8x1xf32>
    %cst_44 = arith.constant 2.000000e+00 : f32
    %131 = vector.broadcast %cst_44 : f32 to vector<8x1xf32>
    %132 = arith.subf %131, %130 : vector<8x1xf32>
    %133 = arith.mulf %129, %132 : vector<8x1xf32>
    %134 = arith.mulf %128, %133 : vector<8x1xf32>
    %cst_45 = arith.constant 2.000000e+00 : f32
    %135 = vector.broadcast %cst_45 : f32 to vector<8x1xf32>
    %136 = arith.subf %135, %134 : vector<8x1xf32>
    %137 = arith.mulf %133, %136 : vector<8x1xf32>
    %138 = arith.mulf %126, %137 : vector<8x1xf32>
    %139 = math.log %138 : vector<8x1xf32>
    %cst_46 = arith.constant 5.000000e-01 : f32
    %140 = vector.broadcast %cst_46 : f32 to vector<8x1xf32>
    %141 = arith.mulf %140, %139 : vector<8x1xf32>
    %cst_47 = arith.constant 1.000000e-01 : f32
    %142 = vector.broadcast %cst_47 : f32 to vector<8x1xf32>
    %143 = arith.mulf %118, %142 : vector<8x1xf32>
    %144 = tpu.reciprocal %143 {approx = true} : vector<8x1xf32> -> vector<8x1xf32>
    %145 = arith.mulf %143, %144 : vector<8x1xf32>
    %cst_48 = arith.constant 2.000000e+00 : f32
    %146 = vector.broadcast %cst_48 : f32 to vector<8x1xf32>
    %147 = arith.subf %146, %145 : vector<8x1xf32>
    %148 = arith.mulf %144, %147 : vector<8x1xf32>
    %149 = arith.mulf %143, %148 : vector<8x1xf32>
    %cst_49 = arith.constant 2.000000e+00 : f32
    %150 = vector.broadcast %cst_49 : f32 to vector<8x1xf32>
    %151 = arith.subf %150, %149 : vector<8x1xf32>
    %152 = arith.mulf %148, %151 : vector<8x1xf32>
    %153 = arith.mulf %141, %152 : vector<8x1xf32>
    %154 = vector.broadcast %153 : vector<8x1xf32> to vector<8x128xf32>
    %155 = arith.mulf %116, %154 : vector<8x128xf32>
    %c0_50 = arith.constant 0 : index
    %c0_51 = arith.constant 0 : index
    %156 = vector.load %arg3[%c0_50, %c0_51] : memref<8x128xf32, #tpu.memory_space<vmem>>, vector<8x128xf32>
    tpu.vector_store %arg3[%c0_50, %c0_51], %155 {strides = array<i32>} : memref<8x128xf32, #tpu.memory_space<vmem>>, vector<8x128xf32>,
    return
  }
  func.func @transform_0(%arg0: i32) -> (i32, i32) {
    %c0_i32 = arith.constant 0 : i32
    %c0_i32_0 = arith.constant 0 : i32
    return %arg0, %c0_i32 : i32, i32
  }
  func.func @transform_1(%arg0: i32) -> (i32, i32) {
    %c0_i32 = arith.constant 0 : i32
    %c0_i32_0 = arith.constant 0 : i32
    %c0_i32_1 = arith.constant 0 : i32
    return %c0_i32, %c0_i32_0 : i32, i32
  }
  func.func @transform_2(%arg0: i32) -> (i32, i32) {
    %c0_i32 = arith.constant 0 : i32
    %c0_i32_0 = arith.constant 0 : i32
    return %arg0, %c0_i32 : i32, i32
  }
}

module attributes {stable_mosaic.version = 11 : i64} {
  func.func @_bdl_kernel(%arg0: i32, %arg1: memref<8x128xf32, #tpu.memory_space<vmem>>, %arg2: memref<128x128xf32, #tpu.memory_space<vmem>>, %arg3: memref<8x128xf32, #tpu.memory_space<vmem>>) attributes {dimension_semantics = [#tpu.dimension_semantics<parallel>], iteration_bounds = array<i64: 2>, scalar_prefetch = 0 : i64, scratch_operands = 0 : i64, tpu.core_type = #tpu.core_type<tc>, window_params = [{transform_indices = @transform_0, window_bounds = array<i64: 8, 128>}, {pipeline_mode = #tpu.pipeline_mode<synchronous>, transform_indices = @transform_1, window_bounds = array<i64: 128, 128>}, {transform_indices = @transform_2, window_bounds = array<i64: 8, 128>}]} {
    %c0 = arith.constant 0 : index
    %c0_0 = arith.constant 0 : index
    %0 = vector.load %arg1[%c0, %c0_0] : memref<8x128xf32, #tpu.memory_space<vmem>>, vector<8x128xf32>
    %c0_1 = arith.constant 0 : index
    %c0_2 = arith.constant 0 : index
    %1 = vector.load %arg2[%c0_1, %c0_2] : memref<128x128xf32, #tpu.memory_space<vmem>>, vector<128x128xf32>
    %2 = arith.mulf %0, %0 : vector<8x128xf32>
    %cst = arith.constant dense<0.000000e+00> : vector<8xf32>
    %3 = vector.multi_reduction <add>, %2, %cst [1] : vector<8x128xf32> to vector<8xf32>
    %4 = vector.shape_cast %3 : vector<8xf32> to vector<8x1xf32>
    %5 = math.sqrt %4 : vector<8x1xf32>
    %cst_3 = arith.constant 9.99999974E-6 : f32
    %6 = vector.broadcast %cst_3 : f32 to vector<8x1xf32>
    %7 = arith.maximumf %5, %6 : vector<8x1xf32>
    %cst_4 = arith.constant 1.000000e-01 : f32
    %8 = vector.broadcast %cst_4 : f32 to vector<8x1xf32>
    %9 = arith.mulf %8, %7 : vector<8x1xf32>
    %cst_5 = arith.constant -1.500000e+01 : f32
    %cst_6 = arith.constant 1.500000e+01 : f32
    %10 = vector.broadcast %cst_5 : f32 to vector<8x1xf32>
    %11 = arith.maximumf %10, %9 : vector<8x1xf32>
    %12 = vector.broadcast %cst_6 : f32 to vector<8x1xf32>
    %13 = arith.minimumf %12, %11 : vector<8x1xf32>
    %14 = math.tanh %13 : vector<8x1xf32>
    %15 = tpu.reciprocal %9 {approx = true} : vector<8x1xf32> -> vector<8x1xf32>
    %16 = arith.mulf %9, %15 : vector<8x1xf32>
    %cst_7 = arith.constant 2.000000e+00 : f32
    %17 = vector.broadcast %cst_7 : f32 to vector<8x1xf32>
    %18 = arith.subf %17, %16 : vector<8x1xf32>
    %19 = arith.mulf %15, %18 : vector<8x1xf32>
    %20 = arith.mulf %9, %19 : vector<8x1xf32>
    %cst_8 = arith.constant 2.000000e+00 : f32
    %21 = vector.broadcast %cst_8 : f32 to vector<8x1xf32>
    %22 = arith.subf %21, %20 : vector<8x1xf32>
    %23 = arith.mulf %19, %22 : vector<8x1xf32>
    %24 = arith.mulf %14, %23 : vector<8x1xf32>
    %25 = vector.broadcast %24 : vector<8x1xf32> to vector<8x128xf32>
    %26 = arith.mulf %0, %25 : vector<8x128xf32>
    %27 = arith.mulf %24, %5 : vector<8x1xf32>
    %cst_9 = arith.constant 9.99999974E-6 : f32
    %28 = vector.broadcast %cst_9 : f32 to vector<8x1xf32>
    %29 = arith.maximumf %27, %28 : vector<8x1xf32>
    %cst_10 = arith.constant dense<0.000000e+00> : vector<8x128xf32>
    %30 = tpu.matmul %26, %1, %cst_10 {dimension_numbers = #tpu.dot_dimension_numbers<[1], [0], [0], [1], [0, 0, 1, 1], [], []>} : vector<8x128xf32>, vector<128x128xf32>, vector<8x128xf32> -> vector<8x128xf32>
    %31 = arith.mulf %30, %30 : vector<8x128xf32>
    %cst_11 = arith.constant dense<0.000000e+00> : vector<8xf32>
    %32 = vector.multi_reduction <add>, %31, %cst_11 [1] : vector<8x128xf32> to vector<8xf32>
    %33 = vector.shape_cast %32 : vector<8xf32> to vector<8x1xf32>
    %34 = math.sqrt %33 : vector<8x1xf32>
    %cst_12 = arith.constant 1.000000e-15 : f32
    %35 = vector.broadcast %cst_12 : f32 to vector<8x1xf32>
    %36 = arith.maximumf %34, %35 : vector<8x1xf32>
    %cst_13 = arith.constant 0.000000e+00 : f32
    %37 = vector.broadcast %cst_13 : f32 to vector<8x1xf32>
    %38 = arith.cmpf oeq, %34, %37 : vector<8x1xf32>
    %39 = tpu.reciprocal %29 {approx = true} : vector<8x1xf32> -> vector<8x1xf32>
    %40 = arith.mulf %29, %39 : vector<8x1xf32>
    %cst_14 = arith.constant 2.000000e+00 : f32
    %41 = vector.broadcast %cst_14 : f32 to vector<8x1xf32>
    %42 = arith.subf %41, %40 : vector<8x1xf32>
    %43 = arith.mulf %39, %42 : vector<8x1xf32>
    %44 = arith.mulf %29, %43 : vector<8x1xf32>
    %cst_15 = arith.constant 2.000000e+00 : f32
    %45 = vector.broadcast %cst_15 : f32 to vector<8x1xf32>
    %46 = arith.subf %45, %44 : vector<8x1xf32>
    %47 = arith.mulf %43, %46 : vector<8x1xf32>
    %48 = arith.mulf %34, %47 : vector<8x1xf32>
    %cst_16 = arith.constant 1.000000e-01 : f32
    %49 = vector.broadcast %cst_16 : f32 to vector<8x1xf32>
    %50 = arith.mulf %49, %29 : vector<8x1xf32>
    %cst_17 = arith.constant -0.999989986 : f32
    %cst_18 = arith.constant 0.999989986 : f32
    %51 = vector.broadcast %cst_17 : f32 to vector<8x1xf32>
    %52 = arith.maximumf %51, %50 : vector<8x1xf32>
    %53 = vector.broadcast %cst_18 : f32 to vector<8x1xf32>
    %54 = arith.minimumf %53, %52 : vector<8x1xf32>
    %cst_19 = arith.constant 1.000000e+00 : f32
    %55 = vector.broadcast %cst_19 : f32 to vector<8x1xf32>
    %56 = arith.addf %55, %54 : vector<8x1xf32>
    %cst_20 = arith.constant 1.000000e+00 : f32
    %57 = vector.broadcast %cst_20 : f32 to vector<8x1xf32>
    %58 = arith.subf %57, %54 : vector<8x1xf32>
    %59 = tpu.reciprocal %58 {approx = true} : vector<8x1xf32> -> vector<8x1xf32>
    %60 = arith.mulf %58, %59 : vector<8x1xf32>
    %cst_21 = arith.constant 2.000000e+00 : f32
    %61 = vector.broadcast %cst_21 : f32 to vector<8x1xf32>
    %62 = arith.subf %61, %60 : vector<8x1xf32>
    %63 = arith.mulf %59, %62 : vector<8x1xf32>
    %64 = arith.mulf %58, %63 : vector<8x1xf32>
    %cst_22 = arith.constant 2.000000e+00 : f32
    %65 = vector.broadcast %cst_22 : f32 to vector<8x1xf32>
    %66 = arith.subf %65, %64 : vector<8x1xf32>
    %67 = arith.mulf %63, %66 : vector<8x1xf32>
    %68 = arith.mulf %56, %67 : vector<8x1xf32>
    %69 = math.log %68 : vector<8x1xf32>
    %cst_23 = arith.constant 5.000000e-01 : f32
    %70 = vector.broadcast %cst_23 : f32 to vector<8x1xf32>
    %71 = arith.mulf %70, %69 : vector<8x1xf32>
    %72 = arith.mulf %48, %71 : vector<8x1xf32>
    %cst_24 = arith.constant -1.500000e+01 : f32
    %cst_25 = arith.constant 1.500000e+01 : f32
    %73 = vector.broadcast %cst_24 : f32 to vector<8x1xf32>
    %74 = arith.maximumf %73, %72 : vector<8x1xf32>
    %75 = vector.broadcast %cst_25 : f32 to vector<8x1xf32>
    %76 = arith.minimumf %75, %74 : vector<8x1xf32>
    %77 = math.tanh %76 : vector<8x1xf32>
    %cst_26 = arith.constant 1.000000e-01 : f32
    %78 = vector.broadcast %cst_26 : f32 to vector<8x1xf32>
    %79 = arith.mulf %36, %78 : vector<8x1xf32>
    %80 = tpu.reciprocal %79 {approx = true} : vector<8x1xf32> -> vector<8x1xf32>
    %81 = arith.mulf %79, %80 : vector<8x1xf32>
    %cst_27 = arith.constant 2.000000e+00 : f32
    %82 = vector.broadcast %cst_27 : f32 to vector<8x1xf32>
    %83 = arith.subf %82, %81 : vector<8x1xf32>
    %84 = arith.mulf %80, %83 : vector<8x1xf32>
    %85 = arith.mulf %79, %84 : vector<8x1xf32>
    %cst_28 = arith.constant 2.000000e+00 : f32
    %86 = vector.broadcast %cst_28 : f32 to vector<8x1xf32>
    %87 = arith.subf %86, %85 : vector<8x1xf32>
    %88 = arith.mulf %84, %87 : vector<8x1xf32>
    %89 = arith.mulf %77, %88 : vector<8x1xf32>
    %cst_29 = arith.constant 0.000000e+00 : f32
    %90 = vector.broadcast %cst_29 : f32 to vector<8x1xf32>
    %91 = arith.select %38, %90, %89 : vector<8x1xi1>, vector<8x1xf32>
    %92 = vector.broadcast %91 : vector<8x1xf32> to vector<8x128xf32>
    %93 = arith.mulf %30, %92 : vector<8x128xf32>
    %cst_30 = arith.constant 1.000000e+01 : f32
    %94 = vector.broadcast %cst_30 : f32 to vector<8x1xf32>
    %95 = arith.mulf %77, %94 : vector<8x1xf32>
    %cst_31 = arith.constant 0.000000e+00 : f32
    %96 = vector.broadcast %cst_31 : f32 to vector<8x1xf32>
    %97 = arith.select %38, %96, %95 : vector<8x1xi1>, vector<8x1xf32>
    %cst_32 = arith.constant 9.99999974E-6 : f32
    %98 = vector.broadcast %cst_32 : f32 to vector<8x1xf32>
    %99 = arith.maximumf %97, %98 : vector<8x1xf32>
    %cst_33 = arith.constant 9.98999977 : f32
    %100 = vector.broadcast %cst_33 : f32 to vector<8x1xf32>
    %101 = arith.cmpf ogt, %99, %100 : vector<8x1xf32>
    %102 = tpu.reciprocal %99 {approx = true} : vector<8x1xf32> -> vector<8x1xf32>
    %103 = arith.mulf %99, %102 : vector<8x1xf32>
    %cst_34 = arith.constant 2.000000e+00 : f32
    %104 = vector.broadcast %cst_34 : f32 to vector<8x1xf32>
    %105 = arith.subf %104, %103 : vector<8x1xf32>
    %106 = arith.mulf %102, %105 : vector<8x1xf32>
    %107 = arith.mulf %99, %106 : vector<8x1xf32>
    %cst_35 = arith.constant 2.000000e+00 : f32
    %108 = vector.broadcast %cst_35 : f32 to vector<8x1xf32>
    %109 = arith.subf %108, %107 : vector<8x1xf32>
    %110 = arith.mulf %106, %109 : vector<8x1xf32>
    %cst_36 = arith.constant 9.98999977 : f32
    %111 = vector.broadcast %cst_36 : f32 to vector<8x1xf32>
    %112 = arith.mulf %111, %110 : vector<8x1xf32>
    %cst_37 = arith.constant 1.000000e+00 : f32
    %113 = vector.broadcast %cst_37 : f32 to vector<8x1xf32>
    %114 = arith.select %101, %112, %113 : vector<8x1xi1>, vector<8x1xf32>
    %115 = vector.broadcast %114 : vector<8x1xf32> to vector<8x128xf32>
    %116 = arith.mulf %93, %115 : vector<8x128xf32>
    %cst_38 = arith.constant 9.98999977 : f32
    %117 = vector.broadcast %cst_38 : f32 to vector<8x1xf32>
    %118 = arith.minimumf %99, %117 : vector<8x1xf32>
    %cst_39 = arith.constant 1.000000e-01 : f32
    %119 = vector.broadcast %cst_39 : f32 to vector<8x1xf32>
    %120 = arith.mulf %119, %118 : vector<8x1xf32>
    %cst_40 = arith.constant -0.999989986 : f32
    %cst_41 = arith.constant 0.999989986 : f32
    %121 = vector.broadcast %cst_40 : f32 to vector<8x1xf32>
    %122 = arith.maximumf %121, %120 : vector<8x1xf32>
    %123 = vector.broadcast %cst_41 : f32 to vector<8x1xf32>
    %124 = arith.minimumf %123, %122 : vector<8x1xf32>
    %cst_42 = arith.constant 1.000000e+00 : f32
    %125 = vector.broadcast %cst_42 : f32 to vector<8x1xf32>
    %126 = arith.addf %125, %124 : vector<8x1xf32>
    %cst_43 = arith.constant 1.000000e+00 : f32
    %127 = vector.broadcast %cst_43 : f32 to vector<8x1xf32>
    %128 = arith.subf %127, %124 : vector<8x1xf32>
    %129 = tpu.reciprocal %128 {approx = true} : vector<8x1xf32> -> vector<8x1xf32>
    %130 = arith.mulf %128, %129 : vector<8x1xf32>
    %cst_44 = arith.constant 2.000000e+00 : f32
    %131 = vector.broadcast %cst_44 : f32 to vector<8x1xf32>
    %132 = arith.subf %131, %130 : vector<8x1xf32>
    %133 = arith.mulf %129, %132 : vector<8x1xf32>
    %134 = arith.mulf %128, %133 : vector<8x1xf32>
    %cst_45 = arith.constant 2.000000e+00 : f32
    %135 = vector.broadcast %cst_45 : f32 to vector<8x1xf32>
    %136 = arith.subf %135, %134 : vector<8x1xf32>
    %137 = arith.mulf %133, %136 : vector<8x1xf32>
    %138 = arith.mulf %126, %137 : vector<8x1xf32>
    %139 = math.log %138 : vector<8x1xf32>
    %cst_46 = arith.constant 5.000000e-01 : f32
    %140 = vector.broadcast %cst_46 : f32 to vector<8x1xf32>
    %141 = arith.mulf %140, %139 : vector<8x1xf32>
    %cst_47 = arith.constant 1.000000e-01 : f32
    %142 = vector.broadcast %cst_47 : f32 to vector<8x1xf32>
    %143 = arith.mulf %118, %142 : vector<8x1xf32>
    %144 = tpu.reciprocal %143 {approx = true} : vector<8x1xf32> -> vector<8x1xf32>
    %145 = arith.mulf %143, %144 : vector<8x1xf32>
    %cst_48 = arith.constant 2.000000e+00 : f32
    %146 = vector.broadcast %cst_48 : f32 to vector<8x1xf32>
    %147 = arith.subf %146, %145 : vector<8x1xf32>
    %148 = arith.mulf %144, %147 : vector<8x1xf32>
    %149 = arith.mulf %143, %148 : vector<8x1xf32>
    %cst_49 = arith.constant 2.000000e+00 : f32
    %150 = vector.broadcast %cst_49 : f32 to vector<8x1xf32>
    %151 = arith.subf %150, %149 : vector<8x1xf32>
    %152 = arith.mulf %148, %151 : vector<8x1xf32>
    %153 = arith.mulf %141, %152 : vector<8x1xf32>
    %154 = vector.broadcast %153 : vector<8x1xf32> to vector<8x128xf32>
    %155 = arith.mulf %116, %154 : vector<8x128xf32>
    %c0_50 = arith.constant 0 : index
    %c0_51 = arith.constant 0 : index
    %156 = vector.load %arg3[%c0_50, %c0_51] : memref<8x128xf32, #tpu.memory_space<vmem>>, vector<8x128xf32>
    tpu.vector_store %arg3[%c0_50, %c0_51], %155 {strides = array<i32>} : memref<8x128xf32, #tpu.memory_space<vmem>>, vector<8x128xf32>,
    return
  }
  func.func @transform_0(%arg0: i32) -> (i32, i32) {
    %c0_i32 = arith.constant 0 : i32
    %c0_i32_0 = arith.constant 0 : i32
    return %arg0, %c0_i32 : i32, i32
  }
  func.func @transform_1(%arg0: i32) -> (i32, i32) {
    %c0_i32 = arith.constant 0 : i32
    %c0_i32_0 = arith.constant 0 : i32
    %c0_i32_1 = arith.constant 0 : i32
    return %c0_i32, %c0_i32_0 : i32, i32
  }
  func.func @transform_2(%arg0: i32) -> (i32, i32) {
    %c0_i32 = arith.constant 0 : i32
    %c0_i32_0 = arith.constant 0 : i32
    return %arg0, %c0_i32 : i32, i32
  }
}

</mosaic_0001>

<bundles_post_ra>
// kernel: tpu_custom_call.1
= control target key start
LH: loop header
LB: loop body
LE: loop exit
PB: predicated region body
PF: predicated region fallthrough
CT: control target
= control target key end

     0   :  { %7 = vsyncpa [#allocation3], 0  ;;  %s1018_s0 = inlined_call_operand.hbm [shape: f32[16,128], index: 0, kind: input, shape index: {}]   ;;  %s1019_s1 = inlined_call_operand.hbm [shape: f32[128,128], index: 1, kind: input, shape index: {}]   ;;  %s1020_s2 = inlined_call_operand.hbm [shape: f32[16,128], index: 2, kind: output, shape index: {}]  }
   0x1   :  { %9 = vsyncpa [#allocation3 + $0x1], 0 }
   0x2   :  { %10 = vsyncpa [#allocation6], 0 }
   0x3   :  { %11 = vsyncpa [#allocation4], 0 }
   0x4   :  { %13 = vsyncpa [#allocation4 + $0x1], 0  ;;  %s808_s9 = smov 0   ;;  %s810_s10 = smov 0  }
   0x5   :  { %s812_s11 = smov 0   ;;  %s814_s12 = smov 0  }
   0x6 LB: > { %s829_s13 = sadd.s32 4294967295, %s783_s12   ;;  %s473_s14 = sadd.s32 4294967294, %s783_s12   ;;  %s783_s12 = sphi %s814_s12, %s1040_s12   ;;  %s779_s11 = sphi %s812_s11, %s1039_s11   ;;  %s775_s10 = sphi %s810_s10, %s1038_s10   ;;  %s771_s9 = sphi %s808_s9, %s1037_s9  }
   0x7   : > { %p39_p0 = scmp.ne.s32.totalorder %s775_s10, %s771_s9  ;;  %p1021_p1 = scmp.eq.s32.totalorder %s829_s13, 0 }
   0x8   : > { %p90_p3 = scmp.eq.s32.totalorder %s473_s14, 1  ;;  %p474_p5 = scmp.ge.s32.totalorder %s783_s12, 1 }
   0x9   : > { %p838_p4 = por %p1021_p1, %p39_p0  ;;  %p97_p7 = scmp.lt.s32.totalorder %s783_s12, 3 }
   0xa   : > { %p843_p6 = por %p90_p3, %p39_p0  ;;  %s785_s18 = smov [#allocation5]  }
   0xb   : > { %s1024_s15 = scalar_select %p838_p4, 1, 0 }
   0xc   : > { %s1025_s16 = scalar_select %p843_p6, 1, 0 }
   0xd   : > { %p848_p8 = pnand %p474_p5, %p97_p7  ;;  %s109_s19 = sshll.u32 %s785_s18, 4  ;;  %s852_s19 = int_to_ptr.vmem [resolvable:$true] %s109_s19 }
   0xe   : > { %s864_s21 = sadd.s32 1, %s783_s12   ;;  %s26_s22 = sadd.s32 1, %s779_s11 }
   0xf   : > { %s1026_s17 = scalar_select %p848_p8, 1, 0 }
  0x10   : > { %p575_p9 = pneg %p848_p8  ;;  %s23_s23 = ssub.s32 %s783_s12, %s864_s21 }
  0x11   : > { %s655_s26 = scalar_lea.hbm %s1019_s1, 2048 }
  0x12   : > { %p859_p11 = pnand %p575_p9, %p1021_p1  ;;  %p656_p12 = scmp.ne.s32.totalorder %s1019_s1, %s655_s26 }
  0x13   : > { %p662_p5 = scmp.lt.u32.totalorder %s655_s26, %s1019_s1 }
  0x14   : > { %p657_p13 = pneg %p859_p11 }
  0x16   : > { %p658_p0 = pnand %p657_p13, %p656_p12 }
  0x18   : > { %p659_p3 = pneg %p658_p0 }
  0x1a   : > { %p664_p7 = pnand %p662_p5, %p659_p3 }
  0x1c   : > { %667 = shalt.err (!%p664_p7)
}
  0x1d   : > { %s668_s3 = scalar_lea.vmem %s852_s19, 2048  ;;  %p676_p2 = scmp.lt.s32.totalorder %s852_s19, %s852_s19 }
  0x1e   : > { %p669_p9 = scmp.ne.s32.totalorder %s852_s19, %s668_s3  ;;  %p677_p6 = scmp.lt.s32.totalorder %s668_s3, %s668_s3 }
  0x20   : > { %p671_p10 = pnand %p669_p9, %p657_p13  ;;  %p678_p4 = por %p677_p6, %p676_p2 }
  0x22   : > { %p672_p1 = pneg %p671_p10 }
  0x24   : > { %p679_p8 = pnand %p678_p4, %p672_p1 }
  0x26   : > { %682 = shalt.err (!%p679_p8)
}
  0x27   : > { %s786_s4 = smov 128   ;;  %s787_s5 = smov 8  }
  0x28   : > { %578 = dma.hbm_to_vmem [thread:$0]  (!%p859_p11), %s1019_s1, 2048, %s852_s19, [#allocation6], %s786_s4, %s786_s4, %s787_s5  }
  0x29   : > { %p24_p2 = scmp.eq.s32.totalorder %s23_s23, 0  ;;  %p33_p1 = scmp.ne.s32.totalorder %s779_s11, %s775_s10 }
  0x2a   : > { %p34_p4 = scmp.eq.s32.totalorder %s783_s12, 0  ;;  %p588_p6 = scmp.lt.s32.totalorder %s783_s12, 2 }
  0x2b   : > { %s895_s8 = scalar_select %p24_p2, %s779_s11, %s26_s22  }
  0x2c   : > { %p35_p8 = por %p34_p4, %p33_p1  ;;  %p1028_p10 = scmp.eq.s32.totalorder %s829_s13, 1 }
  0x2d   : > { %s123_s18 = sand.u32 1, %s779_s11   ;;  %s478_s24 = sshll.u32 %s783_s12, 7 }
  0x2e   : > { %p899_p12 = por %p1028_p10, %p33_p1  ;;  %s477_s25 = sshll.u32 %s123_s18, 3 }
  0x2f   : > { %s908_s27 = scalar_lea.hbm %s1018_s0, %s478_s24  ;;  %s127_s19 = scalar_lea.vmem [#allocation2], %s477_s25 }
  0x30   : > { %s134_s22 = sshll.u32 %s127_s19, 4  ;;  %p910_p11 = pnand %p588_p6, %p35_p8  ;;  %s914_s22 = int_to_ptr.vmem [resolvable:$true] %s134_s22 }
  0x31   : > { %s124_s28 = scalar_lea.sflag [#allocation3], %s123_s18  ;;  %s683_s29 = scalar_lea.hbm %s908_s27, 128 }
  0x32   : > { %p684_p13 = scmp.ne.s32.totalorder %s908_s27, %s683_s29  ;;  %p685_p0 = pneg %p910_p11 }
  0x33   : > { %s688_s4 = scalar_lea.hbm %s1018_s0, 256  ;;  %p689_p7 = scmp.lt.u32.totalorder %s908_s27, %s1018_s0 }
  0x34   : > { %p686_p3 = pnand %p685_p0, %p684_p13  ;;  %p690_p9 = scmp.lt.u32.totalorder %s688_s4, %s683_s29 }
  0x35   : > { %p692_p1 = scmp.lt.u32.totalorder %s683_s29, %s908_s27 }
  0x36   : > { %p687_p5 = pneg %p686_p3  ;;  %p691_p2 = por %p690_p9, %p689_p7 }
  0x38   : > { %p693_p4 = por %p692_p1, %p691_p2 }
  0x3a   : > { %p694_p6 = pnand %p693_p4, %p687_p5 }
  0x3c   : > { %697 = shalt.err (!%p694_p6)
}
  0x3d   : > { %s698_s7 = scalar_lea.vmem %s914_s22, 128  ;;  %s788_s18 = smov [#allocation2]  }
  0x3e   : > { %p699_p8 = scmp.ne.s32.totalorder %s914_s22, %s698_s7  ;;  %s703_s24 = sshll.u32 %s788_s18, 4  ;;  %s704_s24 = int_to_ptr.vmem [resolvable:$false] %s703_s24 }
  0x3f   : > { %s705_s25 = scalar_lea.vmem %s704_s24, 256  ;;  %p706_p3 = scmp.lt.s32.totalorder %s914_s22, %s704_s24 }
  0x40   : > { %p701_p10 = pnand %p699_p8, %p685_p0  ;;  %p707_p7 = scmp.lt.s32.totalorder %s705_s25, %s698_s7 }
  0x42   : > { %p702_p13 = pneg %p701_p10  ;;  %p708_p9 = por %p707_p7, %p706_p3 }
  0x44   : > { %p709_p2 = pnand %p708_p9, %p702_p13 }
  0x46   : > { %712 = shalt.err (!%p709_p2)
}
  0x47   : > { %582 = dma.hbm_to_vmem [thread:$0]  (!%p910_p11), %s908_s27, 128, %s914_s22, %s124_s28  }
  0x48   : > { %p1031_p5 = scmp.ne.s32.totalorder %s1026_s17, 0 }
  0x49   : > { %s944_s20 = sand.u32 (!%p1031_p5), 1, %s775_s10   ;;  %p1032_p0 = scmp.ne.s32.totalorder (!%p1031_p5), %s1024_s15, 0 }
  0x4a   : > { %143 = sbr.rel (%p1031_p5) target bundleno = 735 (0x2df), region = 28  ;;  %s480_s26 = sshll.u32 (!%p1031_p5), %s944_s20, 3 }
  0x4b   : > { %s146_s19 = scalar_lea.sflag (!%p1031_p5), [#allocation3], %s944_s20  ;;  %s149_s29 = scalar_lea.vmem (!%p1031_p5), [#allocation2], %s480_s26 }
  0x51   : > { %758 = dma.done.wait (%p1032_p0), %s146_s19, 128  }
  0x52   : > { %760 = vsyncadd (%p1032_p0), %s146_s19, 4294967168  ;;  %p1033_p11 = scmp.eq.s32.totalorder %s829_s13, 0 }
  0x54   : > { %762 = dma.done.wait (%p1033_p11), [#allocation6], 2048   ;;  %p1034_p1 = pmov %p1033_p11 }
  0x55   : > { %v958_v0 = vld [vmem:[%s149_s29] sm:$0xff]  ;;  %v175_v2 = vld [vmem:[#allocation5] sm:$0xff]  ;;  %v176_v3 = vld [vmem:[#allocation5 + $0x8] sm:$0xff]  ;;  %v789_v5 = vmov 0.0|0.0   ;;  %vm790_vm0 = vmmov 0   ;;  %v791_v8 = vmov 0.0  }
  0x56   : > { %764 = vsyncadd (%p1034_p1), [#allocation6], 4294965248  ;;  %v191_v1 = vmul.f32 %v958_v0, %v958_v0  ;;  %v177_v4 = vld [vmem:[#allocation5 + $0x10] sm:$0xff]  ;;  %543 = vmatprep.subr.bf16.mxu0 %v789_v5  ;;  %v544_v6 = vpack.c.bf16 %v176_v3, %v175_v2  ;;  %v178_v7 = vld [vmem:[#allocation5 + $0x18] sm:$0xff]  ;;  %540 = vmatprep.mubr.msk.f32.mxu0 %vm790_vm0, %v791_v8  ;;  %s488_s15 = sshll.u32 %s829_s13, 7  ;;  %s173_s17 = scalar_lea.vmem [#allocation7], %s480_s26 }
  0x57   : > { %v547_v9 = vpack.c.bf16 %v178_v7, %v177_v4  ;;  %v179_v10 = vld [vmem:[#allocation5 + $0x20] sm:$0xff]  ;;  %v180_v11 = vld [vmem:[#allocation5 + $0x28] sm:$0xff]  ;;  %v181_v13 = vld [vmem:[#allocation5 + $0x30] sm:$0xff]  ;;  %s393_s27 = sshll.u32 %s173_s17, 4  ;;  %s974_s28 = scalar_lea.hbm %s1020_s2, %s488_s15  ;;  %s976_s27 = int_to_ptr.vmem [resolvable:$true] %s393_s27 }
  0x58   : > { %192 = vadd.xlane.f32.xlu0 %v191_v1  ;;  %545 = vmatpush3.bf16.msra.mxu0 %v544_v6  ;;  %v550_v12 = vpack.c.bf16 %v180_v11, %v179_v10  ;;  %v182_v14 = vld [vmem:[#allocation5 + $0x38] sm:$0xff]  ;;  %v183_v16 = vld [vmem:[#allocation5 + $0x40] sm:$0xff]  ;;  %v184_v17 = vld [vmem:[#allocation5 + $0x48] sm:$0xff]  ;;  %s380_s30 = scalar_lea.sflag [#allocation4], %s944_s20  ;;  %s713_s3 = scalar_lea.vmem %s976_s27, 128 }
  0x59   : > { %546 = vmatprep.subr.bf16.mxu0 %v789_v5  ;;  %v553_v15 = vpack.c.bf16 %v182_v14, %v181_v13  ;;  %v556_v18 = vpack.c.bf16 %v184_v17, %v183_v16  ;;  %v185_v19 = vld [vmem:[#allocation5 + $0x50] sm:$0xff]  ;;  %v186_v20 = vld [vmem:[#allocation5 + $0x58] sm:$0xff]  ;;  %v187_v22 = vld [vmem:[#allocation5 + $0x60] sm:$0xff]  ;;  %p714_p4 = scmp.ne.s32.totalorder %s976_s27, %s713_s3  ;;  %s792_s13 = smov [#allocation7]  }
  0x5a   : > { %v559_v21 = vpack.c.bf16 %v186_v20, %v185_v19  ;;  %v188_v23 = vld [vmem:[#allocation5 + $0x68] sm:$0xff]  ;;  %v189_v25 = vld [vmem:[#allocation5 + $0x70] sm:$0xff]  ;;  %v190_v26 = vld [vmem:[#allocation5 + $0x78] sm:$0xff]  ;;  %s717_s4 = sshll.u32 %s792_s13, 4  ;;  %s718_s4 = int_to_ptr.vmem [resolvable:$false] %s717_s4 }
  0x5b   : > { %v562_v24 = vpack.c.bf16 %v188_v23, %v187_v22  ;;  %v565_v27 = vpack.c.bf16 %v190_v26, %v189_v25  ;;  %p715_p6 = pnand %p714_p4, %p899_p12  ;;  %s719_s5 = scalar_lea.vmem %s718_s4, 256 }
  0x5c   : > { %548 = vmatpush3.bf16.msra.mxu0 %v547_v9  ;;  %p720_p10 = scmp.lt.s32.totalorder %s976_s27, %s718_s4  ;;  %p721_p13 = scmp.lt.s32.totalorder %s719_s5, %s713_s3 }
  0x5d   : > { %549 = vmatprep.subr.bf16.mxu0 %v789_v5  ;;  %p716_p8 = pneg %p715_p6 }
  0x5e   : > { %p722_p3 = por %p721_p13, %p720_p10 }
  0x60   : > { %551 = vmatpush3.bf16.msra.mxu0 %v550_v12  ;;  %p723_p7 = pnand %p722_p3, %p716_p8 }
  0x61   : > { %552 = vmatprep.subr.bf16.mxu0 %v789_v5 }
  0x64   : > { %554 = vmatpush3.bf16.msra.mxu0 %v553_v15 }
  0x65   : > { %555 = vmatprep.subr.bf16.mxu0 %v789_v5 }
  0x68   : > { %557 = vmatpush3.bf16.msra.mxu0 %v556_v18 }
  0x69   : > { %558 = vmatprep.subr.bf16.mxu0 %v789_v5 }
  0x6c   : > { %560 = vmatpush3.bf16.msra.mxu0 %v559_v21 }
  0x6d   : > { %561 = vmatprep.subr.bf16.mxu0 %v789_v5 }
  0x70   : > { %563 = vmatpush3.bf16.msra.mxu0 %v562_v24 }
  0x71   : > { %564 = vmatprep.subr.bf16.mxu0 %v789_v5 }
  0x74   : > { %566 = vmatpush3.bf16.msra.mxu0 %v565_v27 }
  0xe5   : > { %v193_v28 = vpop.xlane.xlu0 %192 }
  0xe6   : > { %629 = vrsqrt.f32 %v193_v28  ;;  %vm196_vm1 = vcmp.eq.f32.partialorder %v193_v28, inf  ;;  %v199_v31 = vand.u32 2147483648, %v193_v28  ;;  %vm198_vm2 = vcmp.eq.f32.partialorder %v193_v28, 0.0 }
  0xf0   : > { %v630_v29 = vpop.eup %629 }
  0xf1   : > { %v195_v30 = vmul.f32 %v630_v29, %v193_v28 }
  0xf3   : > { %v197_v32 = vsel %vm196_vm1, %v193_v28, %v195_v30 }
  0xf4   : > { %v200_v33 = vsel %vm198_vm2, %v199_v31, %v197_v32 }
  0xf5   : > { %v201_v34 = vmax.f32 %v200_v33, 1e-05 }
  0xf7   : > { %v202_v35 = vmul.f32 0.1, %v201_v34 }
  0xf9   : > { %631 = vrcp.f32 %v202_v35  ;;  %v483_v36 = vclamps-f32 %v202_v35, 15.0 }
  0xfb   : > { %633 = vtanh.f32 %v483_v36 }
 0x103   : > { %v632_v37 = vpop.eup %631 }
 0x104   : > { %v207_v38 = vmul.f32 %v632_v37, %v202_v35 }
 0x105   : > { %v634_v44 = vpop.eup %633 }
 0x106   : > { %v208_v39 = vsub.f32 2.0, %v207_v38 }
 0x108   : > { %v209_v40 = vmul.f32 %v632_v37, %v208_v39 }
 0x10a   : > { %v210_v41 = vmul.f32 %v209_v40, %v202_v35 }
 0x10c   : > { %v211_v42 = vsub.f32 2.0, %v210_v41 }
 0x10e   : > { %v212_v43 = vmul.f32 %v211_v42, %v209_v40 }
 0x110   : > { %v213_v45 = vmul.f32 %v634_v44, %v212_v43 }
 0x112   : > { %v214_v46 = vmul.f32 %v213_v45, %v958_v0  ;;  %v215_v47 = vmul.f32 %v213_v45, %v200_v33 }
 0x114   : > { %541 = vmatmul.mubr.f32.vlgmr.msra.gmra.mrb[0].mxu0 %v214_v46  ;;  %v216_v51 = vmax.f32 %v215_v47, 1e-05 }
 0x116   : > { %v307_v52 = vmul.f32 0.1, %v216_v51 }
 0x118   : > { %v484_v53 = vclamps-f32 %v307_v52, 0.99999 }
 0x11a   : > { %v311_v54 = vsub.f32 1.0, %v484_v53  ;;  %v310_v63 = vadd.f32 1.0, %v484_v53 }
 0x11c   : > { %635 = vrcp.f32 %v311_v54 }
 0x11d   : > { %637 = vrcp.f32 %v216_v51 }
 0x126   : > { %v636_v55 = vpop.eup %635 }
 0x127   : > { %v313_v56 = vmul.f32 %v636_v55, %v311_v54  ;;  %v638_v61 = vpop.eup %637 }
 0x128   : > { %v300_v0 = vmul.f32 %v638_v61, %v216_v51 }
 0x129   : > { %v314_v57 = vsub.f32 2.0, %v313_v56 }
 0x12a   : > { %v301_v2 = vsub.f32 2.0, %v300_v0 }
 0x12b   : > { %v315_v58 = vmul.f32 %v636_v55, %v314_v57 }
 0x12c   : > { %v302_v4 = vmul.f32 %v638_v61, %v301_v2 }
 0x12d   : > { %v316_v59 = vmul.f32 %v315_v58, %v311_v54 }
 0x12e   : > { %v303_v5 = vmul.f32 %v302_v4, %v216_v51 }
 0x12f   : > { %v317_v60 = vsub.f32 2.0, %v316_v59 }
 0x130   : > { %v304_v7 = vsub.f32 2.0, %v303_v5 }
 0x131   : > { %v318_v62 = vmul.f32 %v317_v60, %v315_v58 }
 0x132   : > { %v305_v12 = vmul.f32 %v304_v7, %v302_v4 }
 0x133   : > { %v319_v1 = vmul.f32 %v318_v62, %v310_v63 }
 0x135   : > { %639 = vlog2.f32 %v319_v1 }
 0x13f   : > { %v640_v6 = vpop.eup %639 }
 0x140   : > { %v321_v9 = vmul.f32 0.6931472, %v640_v6 }
 0x142   : > { %v322_v15 = vmul.f32 0.5, %v321_v9 }
 0x1e7   : > { %v963_v48 = vpop.f32.mrb[0].mxu0 }
 0x1e8   : > { %v542_v49 = vpop.f32.mrb[1].mxu0  ;;  %v287_v50 = vmul.f32 %v963_v48, %v963_v48 }
 0x1ea   : > { %288 = vadd.xlane.f32.xlu0 %v287_v50 }
 0x277   : > { %v289_v3 = vpop.xlane.xlu0 %288 }
 0x278   : > { %641 = vrsqrt.f32 %v289_v3  ;;  %vm292_vm3 = vcmp.eq.f32.partialorder %v289_v3, inf  ;;  %v295_v11 = vand.u32 2147483648, %v289_v3  ;;  %vm294_vm4 = vcmp.eq.f32.partialorder %v289_v3, 0.0 }
 0x282   : > { %v642_v8 = vpop.eup %641 }
 0x283   : > { %v291_v10 = vmul.f32 %v642_v8, %v289_v3 }
 0x285   : > { %v293_v13 = vsel %vm292_vm3, %v289_v3, %v291_v10 }
 0x286   : > { %v296_v14 = vsel %vm294_vm4, %v295_v11, %v293_v13 }
 0x287   : > { %v297_v16 = vmax.f32 %v296_v14, 1e-15  ;;  %v306_v17 = vmul.f32 %v305_v12, %v296_v14  ;;  %vm298_vm5 = vcmp.eq.f32.partialorder %v296_v14, 0.0 }
 0x289   : > { %v323_v18 = vmul.f32 %v322_v15, %v306_v17  ;;  %v327_v19 = vmul.f32 0.1, %v297_v16 }
 0x28b   : > { %v485_v20 = vclamps-f32 %v323_v18, 15.0  ;;  %643 = vrcp.f32 %v327_v19 }
 0x28d   : > { %645 = vtanh.f32 %v485_v20 }
 0x295   : > { %v644_v21 = vpop.eup %643 }
 0x296   : > { %v329_v22 = vmul.f32 %v644_v21, %v327_v19 }
 0x297   : > { %v646_v23 = vpop.eup %645 }
 0x298   : > { %v330_v24 = vsub.f32 2.0, %v329_v22  ;;  %v338_v25 = vmul.f32 10.0, %v646_v23 }
 0x29a   : > { %v331_v26 = vmul.f32 %v644_v21, %v330_v24  ;;  %v339_v27 = vsel %vm298_vm5, 0.0, %v338_v25 }
 0x29b   : > { %v340_v28 = vmax.f32 %v339_v27, 1e-05 }
 0x29c   : > { %v332_v29 = vmul.f32 %v331_v26, %v327_v19 }
 0x29d   : > { %647 = vrcp.f32 %v340_v28  ;;  %v352_v30 = vmin.f32 %v340_v28, 9.99  ;;  %vm341_vm6 = vcmp.gt.f32.partialorder %v340_v28, 9.99 }
 0x29e   : > { %v333_v31 = vsub.f32 2.0, %v332_v29 }
 0x29f   : > { %v353_v32 = vmul.f32 0.1, %v352_v30 }
 0x2a0   : > { %v334_v33 = vmul.f32 %v333_v31, %v331_v26 }
 0x2a1   : > { %v486_v34 = vclamps-f32 %v353_v32, 0.99999 }
 0x2a2   : > { %v335_v35 = vmul.f32 %v646_v23, %v334_v33 }
 0x2a3   : > { %v357_v36 = vsub.f32 1.0, %v486_v34  ;;  %v356_v57 = vadd.f32 1.0, %v486_v34 }
 0x2a4   : > { %v336_v37 = vsel %vm298_vm5, 0.0, %v335_v35 }
 0x2a5   : > { %v337_v38 = vmul.f32 %v336_v37, %v963_v48  ;;  %649 = vrcp.f32 %v357_v36 }
 0x2a6   : > { %651 = vrcp.f32 %v353_v32 }
 0x2a7   : > { %v648_v39 = vpop.eup %647 }
 0x2a8   : > { %v343_v40 = vmul.f32 %v648_v39, %v340_v28 }
 0x2aa   : > { %v344_v41 = vsub.f32 2.0, %v343_v40 }
 0x2ac   : > { %v345_v42 = vmul.f32 %v648_v39, %v344_v41 }
 0x2ae   : > { %v346_v43 = vmul.f32 %v345_v42, %v340_v28 }
 0x2af   : > { %v650_v44 = vpop.eup %649 }
 0x2b0   : > { %v347_v45 = vsub.f32 2.0, %v346_v43  ;;  %v359_v46 = vmul.f32 %v650_v44, %v357_v36  ;;  %v652_v50 = vpop.eup %651 }
 0x2b1   : > { %v370_v55 = vmul.f32 %v652_v50, %v353_v32 }
 0x2b2   : > { %v348_v47 = vmul.f32 %v347_v45, %v345_v42  ;;  %v360_v49 = vsub.f32 2.0, %v359_v46 }
 0x2b3   : > { %v371_v59 = vsub.f32 2.0, %v370_v55 }
 0x2b4   : > { %v349_v51 = vmul.f32 9.99, %v348_v47  ;;  %v361_v52 = vmul.f32 %v650_v44, %v360_v49 }
 0x2b5   : > { %v372_v61 = vmul.f32 %v652_v50, %v371_v59 }
 0x2b6   : > { %v350_v53 = vsel %vm341_vm6, %v349_v51, 1.0  ;;  %v362_v54 = vmul.f32 %v361_v52, %v357_v36 }
 0x2b7   : > { %v351_v48 = vmul.f32 %v350_v53, %v337_v38  ;;  %v373_v62 = vmul.f32 %v372_v61, %v353_v32 }
 0x2b8   : > { %v363_v56 = vsub.f32 2.0, %v362_v54 }
 0x2b9   : > { %v374_v63 = vsub.f32 2.0, %v373_v62 }
 0x2ba   : > { %v364_v58 = vmul.f32 %v363_v56, %v361_v52 }
 0x2bb   : > { %v375_v3 = vmul.f32 %v374_v63, %v372_v61 }
 0x2bc   : > { %v365_v60 = vmul.f32 %v364_v58, %v356_v57 }
 0x2be   : > { %653 = vlog2.f32 %v365_v60 }
 0x2c8   : > { %v654_v0 = vpop.eup %653 }
 0x2c9   : > { %v367_v1 = vmul.f32 0.6931472, %v654_v0 }
 0x2cb   : > { %v368_v2 = vmul.f32 0.5, %v367_v1 }
 0x2cd   : > { %v376_v4 = vmul.f32 %v375_v3, %v368_v2 }
 0x2cf   : > { %v377_v5 = vmul.f32 %v376_v4, %v351_v48 }
 0x2d1   : > { %378 = vst [vmem:[%s173_s17] sm:$0xff] %v377_v5 }
 0x2d2   : > { %726 = shalt.err (!%p723_p7)
}
 0x2d3   : > { %s727_s6 = scalar_lea.hbm %s974_s28, 128  ;;  %s731_s24 = scalar_lea.hbm %s1020_s2, 256 }
 0x2d4   : > { %p728_p9 = scmp.ne.s32.totalorder %s974_s28, %s727_s6  ;;  %p732_p0 = scmp.lt.u32.totalorder %s974_s28, %s1020_s2 }
 0x2d5   : > { %p733_p11 = scmp.lt.u32.totalorder %s731_s24, %s727_s6  ;;  %p735_p4 = scmp.lt.u32.totalorder %s727_s6, %s974_s28 }
 0x2d6   : > { %p729_p2 = pnand %p728_p9, %p899_p12 }
 0x2d7   : > { %p734_p1 = por %p733_p11, %p732_p0 }
 0x2d8   : > { %p730_p5 = pneg %p729_p2 }
 0x2d9   : > { %p736_p6 = por %p735_p4, %p734_p1 }
 0x2db   : > { %p737_p8 = pnand %p736_p6, %p730_p5 }
 0x2dd   : > { %740 = shalt.err (!%p737_p8)
}
 0x2de   : > { %573 = dma.vmem_to_hbm [thread:$0]  (%p899_p12), %s976_s27, 128, %s974_s28, %s380_s30  }
 0x2df PF: > { %s405_s26 = sand.u32 1, %s771_s9   ;;  %p1035_p10 = scmp.ne.s32.totalorder %s1025_s16, 0 }
 0x2e0   : > { %p1036_p13 = scmp.ge.s32.totalorder %s783_s12, 2  ;;  %s406_s19 = scalar_lea.sflag [#allocation4], %s405_s26 }
 0x2e2   : > { %p584_p3 = pnand %p1036_p13, %p1035_p10 }
 0x2e4   : > { %766 = dma.done.wait (!%p584_p3), %s406_s19, 128  }
 0x2e5   : > { %768 = vsyncadd (!%p584_p3), %s406_s19, 4294967168  ;;  %p16_p7 = scmp.ge.s32.totalorder %s864_s21, 4   ;;  %s1037_s9 = smov %s775_s10 }
 0x2e6   : > { %s1038_s10 = smov %s779_s11  ;;  %s1039_s11 = smov %s895_s8 }
 0x2e7   : > { %s1040_s12 = smov %s864_s21  ;;  %18 = sbr.rel (!%p16_p7) target bundleno = 6 (0x6), region = 77 }
 0x2ee   :  { %411 = vsyncpa [#allocation3], 1 }
 0x2ef   :  { %413 = vsyncpa [#allocation3 + $0x1], 1 }
 0x2f0   :  { %414 = vsyncpa [#allocation6], 1 }
 0x2f1   :  { %415 = vsyncpa [#allocation4], 1 }
 0x2f2   :  { %417 = vsyncpa [#allocation4 + $0x1], 1 }

// kernel: tpu_custom_call.1
= control target key start
LH: loop header
LB: loop body
LE: loop exit
PB: predicated region body
PF: predicated region fallthrough
CT: control target
= control target key end

     0   :  { %7 = vsyncpa [#allocation3], 0  ;;  %s1018_s0 = inlined_call_operand.hbm [shape: f32[16,128], index: 0, kind: input, shape index: {}]   ;;  %s1019_s1 = inlined_call_operand.hbm [shape: f32[128,128], index: 1, kind: input, shape index: {}]   ;;  %s1020_s2 = inlined_call_operand.hbm [shape: f32[16,128], index: 2, kind: output, shape index: {}]  }
   0x1   :  { %9 = vsyncpa [#allocation3 + $0x1], 0 }
   0x2   :  { %10 = vsyncpa [#allocation6], 0 }
   0x3   :  { %11 = vsyncpa [#allocation4], 0 }
   0x4   :  { %13 = vsyncpa [#allocation4 + $0x1], 0  ;;  %s808_s9 = smov 0   ;;  %s810_s10 = smov 0  }
   0x5   :  { %s812_s11 = smov 0   ;;  %s814_s12 = smov 0  }
   0x6 LB: > { %s829_s13 = sadd.s32 4294967295, %s783_s12   ;;  %s473_s14 = sadd.s32 4294967294, %s783_s12   ;;  %s783_s12 = sphi %s814_s12, %s1040_s12   ;;  %s779_s11 = sphi %s812_s11, %s1039_s11   ;;  %s775_s10 = sphi %s810_s10, %s1038_s10   ;;  %s771_s9 = sphi %s808_s9, %s1037_s9  }
   0x7   : > { %p39_p0 = scmp.ne.s32.totalorder %s775_s10, %s771_s9  ;;  %p1021_p1 = scmp.eq.s32.totalorder %s829_s13, 0 }
   0x8   : > { %p90_p3 = scmp.eq.s32.totalorder %s473_s14, 1  ;;  %p474_p5 = scmp.ge.s32.totalorder %s783_s12, 1 }
   0x9   : > { %p838_p4 = por %p1021_p1, %p39_p0  ;;  %p97_p7 = scmp.lt.s32.totalorder %s783_s12, 3 }
   0xa   : > { %p843_p6 = por %p90_p3, %p39_p0  ;;  %s785_s18 = smov [#allocation5]  }
   0xb   : > { %s1024_s15 = scalar_select %p838_p4, 1, 0 }
   0xc   : > { %s1025_s16 = scalar_select %p843_p6, 1, 0 }
   0xd   : > { %p848_p8 = pnand %p474_p5, %p97_p7  ;;  %s109_s19 = sshll.u32 %s785_s18, 4  ;;  %s852_s19 = int_to_ptr.vmem [resolvable:$true] %s109_s19 }
   0xe   : > { %s864_s21 = sadd.s32 1, %s783_s12   ;;  %s26_s22 = sadd.s32 1, %s779_s11 }
   0xf   : > { %s1026_s17 = scalar_select %p848_p8, 1, 0 }
  0x10   : > { %p575_p9 = pneg %p848_p8  ;;  %s23_s23 = ssub.s32 %s783_s12, %s864_s21 }
  0x11   : > { %s655_s26 = scalar_lea.hbm %s1019_s1, 2048 }
  0x12   : > { %p859_p11 = pnand %p575_p9, %p1021_p1  ;;  %p656_p12 = scmp.ne.s32.totalorder %s1019_s1, %s655_s26 }
  0x13   : > { %p662_p5 = scmp.lt.u32.totalorder %s655_s26, %s1019_s1 }
  0x14   : > { %p657_p13 = pneg %p859_p11 }
  0x16   : > { %p658_p0 = pnand %p657_p13, %p656_p12 }
  0x18   : > { %p659_p3 = pneg %p658_p0 }
  0x1a   : > { %p664_p7 = pnand %p662_p5, %p659_p3 }
  0x1c   : > { %667 = shalt.err (!%p664_p7)
}
  0x1d   : > { %s668_s3 = scalar_lea.vmem %s852_s19, 2048  ;;  %p676_p2 = scmp.lt.s32.totalorder %s852_s19, %s852_s19 }
  0x1e   : > { %p669_p9 = scmp.ne.s32.totalorder %s852_s19, %s668_s3  ;;  %p677_p6 = scmp.lt.s32.totalorder %s668_s3, %s668_s3 }
  0x20   : > { %p671_p10 = pnand %p669_p9, %p657_p13  ;;  %p678_p4 = por %p677_p6, %p676_p2 }
  0x22   : > { %p672_p1 = pneg %p671_p10 }
  0x24   : > { %p679_p8 = pnand %p678_p4, %p672_p1 }
  0x26   : > { %682 = shalt.err (!%p679_p8)
}
  0x27   : > { %s786_s4 = smov 128   ;;  %s787_s5 = smov 8  }
  0x28   : > { %578 = dma.hbm_to_vmem [thread:$0]  (!%p859_p11), %s1019_s1, 2048, %s852_s19, [#allocation6], %s786_s4, %s786_s4, %s787_s5  }
  0x29   : > { %p24_p2 = scmp.eq.s32.totalorder %s23_s23, 0  ;;  %p33_p1 = scmp.ne.s32.totalorder %s779_s11, %s775_s10 }
  0x2a   : > { %p34_p4 = scmp.eq.s32.totalorder %s783_s12, 0  ;;  %p588_p6 = scmp.lt.s32.totalorder %s783_s12, 2 }
  0x2b   : > { %s895_s8 = scalar_select %p24_p2, %s779_s11, %s26_s22  }
  0x2c   : > { %p35_p8 = por %p34_p4, %p33_p1  ;;  %p1028_p10 = scmp.eq.s32.totalorder %s829_s13, 1 }
  0x2d   : > { %s123_s18 = sand.u32 1, %s779_s11   ;;  %s478_s24 = sshll.u32 %s783_s12, 7 }
  0x2e   : > { %p899_p12 = por %p1028_p10, %p33_p1  ;;  %s477_s25 = sshll.u32 %s123_s18, 3 }
  0x2f   : > { %s908_s27 = scalar_lea.hbm %s1018_s0, %s478_s24  ;;  %s127_s19 = scalar_lea.vmem [#allocation2], %s477_s25 }
  0x30   : > { %s134_s22 = sshll.u32 %s127_s19, 4  ;;  %p910_p11 = pnand %p588_p6, %p35_p8  ;;  %s914_s22 = int_to_ptr.vmem [resolvable:$true] %s134_s22 }
  0x31   : > { %s124_s28 = scalar_lea.sflag [#allocation3], %s123_s18  ;;  %s683_s29 = scalar_lea.hbm %s908_s27, 128 }
  0x32   : > { %p684_p13 = scmp.ne.s32.totalorder %s908_s27, %s683_s29  ;;  %p685_p0 = pneg %p910_p11 }
  0x33   : > { %s688_s4 = scalar_lea.hbm %s1018_s0, 256  ;;  %p689_p7 = scmp.lt.u32.totalorder %s908_s27, %s1018_s0 }
  0x34   : > { %p686_p3 = pnand %p685_p0, %p684_p13  ;;  %p690_p9 = scmp.lt.u32.totalorder %s688_s4, %s683_s29 }
  0x35   : > { %p692_p1 = scmp.lt.u32.totalorder %s683_s29, %s908_s27 }
  0x36   : > { %p687_p5 = pneg %p686_p3  ;;  %p691_p2 = por %p690_p9, %p689_p7 }
  0x38   : > { %p693_p4 = por %p692_p1, %p691_p2 }
  0x3a   : > { %p694_p6 = pnand %p693_p4, %p687_p5 }
  0x3c   : > { %697 = shalt.err (!%p694_p6)
}
  0x3d   : > { %s698_s7 = scalar_lea.vmem %s914_s22, 128  ;;  %s788_s18 = smov [#allocation2]  }
  0x3e   : > { %p699_p8 = scmp.ne.s32.totalorder %s914_s22, %s698_s7  ;;  %s703_s24 = sshll.u32 %s788_s18, 4  ;;  %s704_s24 = int_to_ptr.vmem [resolvable:$false] %s703_s24 }
  0x3f   : > { %s705_s25 = scalar_lea.vmem %s704_s24, 256  ;;  %p706_p3 = scmp.lt.s32.totalorder %s914_s22, %s704_s24 }
  0x40   : > { %p701_p10 = pnand %p699_p8, %p685_p0  ;;  %p707_p7 = scmp.lt.s32.totalorder %s705_s25, %s698_s7 }
  0x42   : > { %p702_p13 = pneg %p701_p10  ;;  %p708_p9 = por %p707_p7, %p706_p3 }
  0x44   : > { %p709_p2 = pnand %p708_p9, %p702_p13 }
  0x46   : > { %712 = shalt.err (!%p709_p2)
}
  0x47   : > { %582 = dma.hbm_to_vmem [thread:$0]  (!%p910_p11), %s908_s27, 128, %s914_s22, %s124_s28  }
  0x48   : > { %p1031_p5 = scmp.ne.s32.totalorder %s1026_s17, 0 }
  0x49   : > { %s944_s20 = sand.u32 (!%p1031_p5), 1, %s775_s10   ;;  %p1032_p0 = scmp.ne.s32.totalorder (!%p1031_p5), %s1024_s15, 0 }
  0x4a   : > { %143 = sbr.rel (%p1031_p5) target bundleno = 735 (0x2df), region = 28  ;;  %s480_s26 = sshll.u32 (!%p1031_p5), %s944_s20, 3 }
  0x4b   : > { %s146_s19 = scalar_lea.sflag (!%p1031_p5), [#allocation3], %s944_s20  ;;  %s149_s29 = scalar_lea.vmem (!%p1031_p5), [#allocation2], %s480_s26 }
  0x51   : > { %758 = dma.done.wait (%p1032_p0), %s146_s19, 128  }
  0x52   : > { %760 = vsyncadd (%p1032_p0), %s146_s19, 4294967168  ;;  %p1033_p11 = scmp.eq.s32.totalorder %s829_s13, 0 }
  0x54   : > { %762 = dma.done.wait (%p1033_p11), [#allocation6], 2048   ;;  %p1034_p1 = pmov %p1033_p11 }
  0x55   : > { %v958_v0 = vld [vmem:[%s149_s29] sm:$0xff]  ;;  %v175_v2 = vld [vmem:[#allocation5] sm:$0xff]  ;;  %v176_v3 = vld [vmem:[#allocation5 + $0x8] sm:$0xff]  ;;  %v789_v5 = vmov 0.0|0.0   ;;  %vm790_vm0 = vmmov 0   ;;  %v791_v8 = vmov 0.0  }
  0x56   : > { %764 = vsyncadd (%p1034_p1), [#allocation6], 4294965248  ;;  %v191_v1 = vmul.f32 %v958_v0, %v958_v0  ;;  %v177_v4 = vld [vmem:[#allocation5 + $0x10] sm:$0xff]  ;;  %543 = vmatprep.subr.bf16.mxu0 %v789_v5  ;;  %v544_v6 = vpack.c.bf16 %v176_v3, %v175_v2  ;;  %v178_v7 = vld [vmem:[#allocation5 + $0x18] sm:$0xff]  ;;  %540 = vmatprep.mubr.msk.f32.mxu0 %vm790_vm0, %v791_v8  ;;  %s488_s15 = sshll.u32 %s829_s13, 7  ;;  %s173_s17 = scalar_lea.vmem [#allocation7], %s480_s26 }
  0x57   : > { %v547_v9 = vpack.c.bf16 %v178_v7, %v177_v4  ;;  %v179_v10 = vld [vmem:[#allocation5 + $0x20] sm:$0xff]  ;;  %v180_v11 = vld [vmem:[#allocation5 + $0x28] sm:$0xff]  ;;  %v181_v13 = vld [vmem:[#allocation5 + $0x30] sm:$0xff]  ;;  %s393_s27 = sshll.u32 %s173_s17, 4  ;;  %s974_s28 = scalar_lea.hbm %s1020_s2, %s488_s15  ;;  %s976_s27 = int_to_ptr.vmem [resolvable:$true] %s393_s27 }
  0x58   : > { %192 = vadd.xlane.f32.xlu0 %v191_v1  ;;  %545 = vmatpush3.bf16.msra.mxu0 %v544_v6  ;;  %v550_v12 = vpack.c.bf16 %v180_v11, %v179_v10  ;;  %v182_v14 = vld [vmem:[#allocation5 + $0x38] sm:$0xff]  ;;  %v183_v16 = vld [vmem:[#allocation5 + $0x40] sm:$0xff]  ;;  %v184_v17 = vld [vmem:[#allocation5 + $0x48] sm:$0xff]  ;;  %s380_s30 = scalar_lea.sflag [#allocation4], %s944_s20  ;;  %s713_s3 = scalar_lea.vmem %s976_s27, 128 }
  0x59   : > { %546 = vmatprep.subr.bf16.mxu0 %v789_v5  ;;  %v553_v15 = vpack.c.bf16 %v182_v14, %v181_v13  ;;  %v556_v18 = vpack.c.bf16 %v184_v17, %v183_v16  ;;  %v185_v19 = vld [vmem:[#allocation5 + $0x50] sm:$0xff]  ;;  %v186_v20 = vld [vmem:[#allocation5 + $0x58] sm:$0xff]  ;;  %v187_v22 = vld [vmem:[#allocation5 + $0x60] sm:$0xff]  ;;  %p714_p4 = scmp.ne.s32.totalorder %s976_s27, %s713_s3  ;;  %s792_s13 = smov [#allocation7]  }
  0x5a   : > { %v559_v21 = vpack.c.bf16 %v186_v20, %v185_v19  ;;  %v188_v23 = vld [vmem:[#allocation5 + $0x68] sm:$0xff]  ;;  %v189_v25 = vld [vmem:[#allocation5 + $0x70] sm:$0xff]  ;;  %v190_v26 = vld [vmem:[#allocation5 + $0x78] sm:$0xff]  ;;  %s717_s4 = sshll.u32 %s792_s13, 4  ;;  %s718_s4 = int_to_ptr.vmem [resolvable:$false] %s717_s4 }
  0x5b   : > { %v562_v24 = vpack.c.bf16 %v188_v23, %v187_v22  ;;  %v565_v27 = vpack.c.bf16 %v190_v26, %v189_v25  ;;  %p715_p6 = pnand %p714_p4, %p899_p12  ;;  %s719_s5 = scalar_lea.vmem %s718_s4, 256 }
  0x5c   : > { %548 = vmatpush3.bf16.msra.mxu0 %v547_v9  ;;  %p720_p10 = scmp.lt.s32.totalorder %s976_s27, %s718_s4  ;;  %p721_p13 = scmp.lt.s32.totalorder %s719_s5, %s713_s3 }
  0x5d   : > { %549 = vmatprep.subr.bf16.mxu0 %v789_v5  ;;  %p716_p8 = pneg %p715_p6 }
  0x5e   : > { %p722_p3 = por %p721_p13, %p720_p10 }
  0x60   : > { %551 = vmatpush3.bf16.msra.mxu0 %v550_v12  ;;  %p723_p7 = pnand %p722_p3, %p716_p8 }
  0x61   : > { %552 = vmatprep.subr.bf16.mxu0 %v789_v5 }
  0x64   : > { %554 = vmatpush3.bf16.msra.mxu0 %v553_v15 }
  0x65   : > { %555 = vmatprep.subr.bf16.mxu0 %v789_v5 }
  0x68   : > { %557 = vmatpush3.bf16.msra.mxu0 %v556_v18 }
  0x69   : > { %558 = vmatprep.subr.bf16.mxu0 %v789_v5 }
  0x6c   : > { %560 = vmatpush3.bf16.msra.mxu0 %v559_v21 }
  0x6d   : > { %561 = vmatprep.subr.bf16.mxu0 %v789_v5 }
  0x70   : > { %563 = vmatpush3.bf16.msra.mxu0 %v562_v24 }
  0x71   : > { %564 = vmatprep.subr.bf16.mxu0 %v789_v5 }
  0x74   : > { %566 = vmatpush3.bf16.msra.mxu0 %v565_v27 }
  0xe5   : > { %v193_v28 = vpop.xlane.xlu0 %192 }
  0xe6   : > { %629 = vrsqrt.f32 %v193_v28  ;;  %vm196_vm1 = vcmp.eq.f32.partialorder %v193_v28, inf  ;;  %v199_v31 = vand.u32 2147483648, %v193_v28  ;;  %vm198_vm2 = vcmp.eq.f32.partialorder %v193_v28, 0.0 }
  0xf0   : > { %v630_v29 = vpop.eup %629 }
  0xf1   : > { %v195_v30 = vmul.f32 %v630_v29, %v193_v28 }
  0xf3   : > { %v197_v32 = vsel %vm196_vm1, %v193_v28, %v195_v30 }
  0xf4   : > { %v200_v33 = vsel %vm198_vm2, %v199_v31, %v197_v32 }
  0xf5   : > { %v201_v34 = vmax.f32 %v200_v33, 1e-05 }
  0xf7   : > { %v202_v35 = vmul.f32 0.1, %v201_v34 }
  0xf9   : > { %631 = vrcp.f32 %v202_v35  ;;  %v483_v36 = vclamps-f32 %v202_v35, 15.0 }
  0xfb   : > { %633 = vtanh.f32 %v483_v36 }
 0x103   : > { %v632_v37 = vpop.eup %631 }
 0x104   : > { %v207_v38 = vmul.f32 %v632_v37, %v202_v35 }
 0x105   : > { %v634_v44 = vpop.eup %633 }
 0x106   : > { %v208_v39 = vsub.f32 2.0, %v207_v38 }
 0x108   : > { %v209_v40 = vmul.f32 %v632_v37, %v208_v39 }
 0x10a   : > { %v210_v41 = vmul.f32 %v209_v40, %v202_v35 }
 0x10c   : > { %v211_v42 = vsub.f32 2.0, %v210_v41 }
 0x10e   : > { %v212_v43 = vmul.f32 %v211_v42, %v209_v40 }
 0x110   : > { %v213_v45 = vmul.f32 %v634_v44, %v212_v43 }
 0x112   : > { %v214_v46 = vmul.f32 %v213_v45, %v958_v0  ;;  %v215_v47 = vmul.f32 %v213_v45, %v200_v33 }
 0x114   : > { %541 = vmatmul.mubr.f32.vlgmr.msra.gmra.mrb[0].mxu0 %v214_v46  ;;  %v216_v51 = vmax.f32 %v215_v47, 1e-05 }
 0x116   : > { %v307_v52 = vmul.f32 0.1, %v216_v51 }
 0x118   : > { %v484_v53 = vclamps-f32 %v307_v52, 0.99999 }
 0x11a   : > { %v311_v54 = vsub.f32 1.0, %v484_v53  ;;  %v310_v63 = vadd.f32 1.0, %v484_v53 }
 0x11c   : > { %635 = vrcp.f32 %v311_v54 }
 0x11d   : > { %637 = vrcp.f32 %v216_v51 }
 0x126   : > { %v636_v55 = vpop.eup %635 }
 0x127   : > { %v313_v56 = vmul.f32 %v636_v55, %v311_v54  ;;  %v638_v61 = vpop.eup %637 }
 0x128   : > { %v300_v0 = vmul.f32 %v638_v61, %v216_v51 }
 0x129   : > { %v314_v57 = vsub.f32 2.0, %v313_v56 }
 0x12a   : > { %v301_v2 = vsub.f32 2.0, %v300_v0 }
 0x12b   : > { %v315_v58 = vmul.f32 %v636_v55, %v314_v57 }
 0x12c   : > { %v302_v4 = vmul.f32 %v638_v61, %v301_v2 }
 0x12d   : > { %v316_v59 = vmul.f32 %v315_v58, %v311_v54 }
 0x12e   : > { %v303_v5 = vmul.f32 %v302_v4, %v216_v51 }
 0x12f   : > { %v317_v60 = vsub.f32 2.0, %v316_v59 }
 0x130   : > { %v304_v7 = vsub.f32 2.0, %v303_v5 }
 0x131   : > { %v318_v62 = vmul.f32 %v317_v60, %v315_v58 }
 0x132   : > { %v305_v12 = vmul.f32 %v304_v7, %v302_v4 }
 0x133   : > { %v319_v1 = vmul.f32 %v318_v62, %v310_v63 }
 0x135   : > { %639 = vlog2.f32 %v319_v1 }
 0x13f   : > { %v640_v6 = vpop.eup %639 }
 0x140   : > { %v321_v9 = vmul.f32 0.6931472, %v640_v6 }
 0x142   : > { %v322_v15 = vmul.f32 0.5, %v321_v9 }
 0x1e7   : > { %v963_v48 = vpop.f32.mrb[0].mxu0 }
 0x1e8   : > { %v542_v49 = vpop.f32.mrb[1].mxu0  ;;  %v287_v50 = vmul.f32 %v963_v48, %v963_v48 }
 0x1ea   : > { %288 = vadd.xlane.f32.xlu0 %v287_v50 }
 0x277   : > { %v289_v3 = vpop.xlane.xlu0 %288 }
 0x278   : > { %641 = vrsqrt.f32 %v289_v3  ;;  %vm292_vm3 = vcmp.eq.f32.partialorder %v289_v3, inf  ;;  %v295_v11 = vand.u32 2147483648, %v289_v3  ;;  %vm294_vm4 = vcmp.eq.f32.partialorder %v289_v3, 0.0 }
 0x282   : > { %v642_v8 = vpop.eup %641 }
 0x283   : > { %v291_v10 = vmul.f32 %v642_v8, %v289_v3 }
 0x285   : > { %v293_v13 = vsel %vm292_vm3, %v289_v3, %v291_v10 }
 0x286   : > { %v296_v14 = vsel %vm294_vm4, %v295_v11, %v293_v13 }
 0x287   : > { %v297_v16 = vmax.f32 %v296_v14, 1e-15  ;;  %v306_v17 = vmul.f32 %v305_v12, %v296_v14  ;;  %vm298_vm5 = vcmp.eq.f32.partialorder %v296_v14, 0.0 }
 0x289   : > { %v323_v18 = vmul.f32 %v322_v15, %v306_v17  ;;  %v327_v19 = vmul.f32 0.1, %v297_v16 }
 0x28b   : > { %v485_v20 = vclamps-f32 %v323_v18, 15.0  ;;  %643 = vrcp.f32 %v327_v19 }
 0x28d   : > { %645 = vtanh.f32 %v485_v20 }
 0x295   : > { %v644_v21 = vpop.eup %643 }
 0x296   : > { %v329_v22 = vmul.f32 %v644_v21, %v327_v19 }
 0x297   : > { %v646_v23 = vpop.eup %645 }
 0x298   : > { %v330_v24 = vsub.f32 2.0, %v329_v22  ;;  %v338_v25 = vmul.f32 10.0, %v646_v23 }
 0x29a   : > { %v331_v26 = vmul.f32 %v644_v21, %v330_v24  ;;  %v339_v27 = vsel %vm298_vm5, 0.0, %v338_v25 }
 0x29b   : > { %v340_v28 = vmax.f32 %v339_v27, 1e-05 }
 0x29c   : > { %v332_v29 = vmul.f32 %v331_v26, %v327_v19 }
 0x29d   : > { %647 = vrcp.f32 %v340_v28  ;;  %v352_v30 = vmin.f32 %v340_v28, 9.99  ;;  %vm341_vm6 = vcmp.gt.f32.partialorder %v340_v28, 9.99 }
 0x29e   : > { %v333_v31 = vsub.f32 2.0, %v332_v29 }
 0x29f   : > { %v353_v32 = vmul.f32 0.1, %v352_v30 }
 0x2a0   : > { %v334_v33 = vmul.f32 %v333_v31, %v331_v26 }
 0x2a1   : > { %v486_v34 = vclamps-f32 %v353_v32, 0.99999 }
 0x2a2   : > { %v335_v35 = vmul.f32 %v646_v23, %v334_v33 }
 0x2a3   : > { %v357_v36 = vsub.f32 1.0, %v486_v34  ;;  %v356_v57 = vadd.f32 1.0, %v486_v34 }
 0x2a4   : > { %v336_v37 = vsel %vm298_vm5, 0.0, %v335_v35 }
 0x2a5   : > { %v337_v38 = vmul.f32 %v336_v37, %v963_v48  ;;  %649 = vrcp.f32 %v357_v36 }
 0x2a6   : > { %651 = vrcp.f32 %v353_v32 }
 0x2a7   : > { %v648_v39 = vpop.eup %647 }
 0x2a8   : > { %v343_v40 = vmul.f32 %v648_v39, %v340_v28 }
 0x2aa   : > { %v344_v41 = vsub.f32 2.0, %v343_v40 }
 0x2ac   : > { %v345_v42 = vmul.f32 %v648_v39, %v344_v41 }
 0x2ae   : > { %v346_v43 = vmul.f32 %v345_v42, %v340_v28 }
 0x2af   : > { %v650_v44 = vpop.eup %649 }
 0x2b0   : > { %v347_v45 = vsub.f32 2.0, %v346_v43  ;;  %v359_v46 = vmul.f32 %v650_v44, %v357_v36  ;;  %v652_v50 = vpop.eup %651 }
 0x2b1   : > { %v370_v55 = vmul.f32 %v652_v50, %v353_v32 }
 0x2b2   : > { %v348_v47 = vmul.f32 %v347_v45, %v345_v42  ;;  %v360_v49 = vsub.f32 2.0, %v359_v46 }
 0x2b3   : > { %v371_v59 = vsub.f32 2.0, %v370_v55 }
 0x2b4   : > { %v349_v51 = vmul.f32 9.99, %v348_v47  ;;  %v361_v52 = vmul.f32 %v650_v44, %v360_v49 }
 0x2b5   : > { %v372_v61 = vmul.f32 %v652_v50, %v371_v59 }
 0x2b6   : > { %v350_v53 = vsel %vm341_vm6, %v349_v51, 1.0  ;;  %v362_v54 = vmul.f32 %v361_v52, %v357_v36 }
 0x2b7   : > { %v351_v48 = vmul.f32 %v350_v53, %v337_v38  ;;  %v373_v62 = vmul.f32 %v372_v61, %v353_v32 }
 0x2b8   : > { %v363_v56 = vsub.f32 2.0, %v362_v54 }
 0x2b9   : > { %v374_v63 = vsub.f32 2.0, %v373_v62 }
 0x2ba   : > { %v364_v58 = vmul.f32 %v363_v56, %v361_v52 }
 0x2bb   : > { %v375_v3 = vmul.f32 %v374_v63, %v372_v61 }
 0x2bc   : > { %v365_v60 = vmul.f32 %v364_v58, %v356_v57 }
 0x2be   : > { %653 = vlog2.f32 %v365_v60 }
 0x2c8   : > { %v654_v0 = vpop.eup %653 }
 0x2c9   : > { %v367_v1 = vmul.f32 0.6931472, %v654_v0 }
 0x2cb   : > { %v368_v2 = vmul.f32 0.5, %v367_v1 }
 0x2cd   : > { %v376_v4 = vmul.f32 %v375_v3, %v368_v2 }
 0x2cf   : > { %v377_v5 = vmul.f32 %v376_v4, %v351_v48 }
 0x2d1   : > { %378 = vst [vmem:[%s173_s17] sm:$0xff] %v377_v5 }
 0x2d2   : > { %726 = shalt.err (!%p723_p7)
}
 0x2d3   : > { %s727_s6 = scalar_lea.hbm %s974_s28, 128  ;;  %s731_s24 = scalar_lea.hbm %s1020_s2, 256 }
 0x2d4   : > { %p728_p9 = scmp.ne.s32.totalorder %s974_s28, %s727_s6  ;;  %p732_p0 = scmp.lt.u32.totalorder %s974_s28, %s1020_s2 }
 0x2d5   : > { %p733_p11 = scmp.lt.u32.totalorder %s731_s24, %s727_s6  ;;  %p735_p4 = scmp.lt.u32.totalorder %s727_s6, %s974_s28 }
 0x2d6   : > { %p729_p2 = pnand %p728_p9, %p899_p12 }
 0x2d7   : > { %p734_p1 = por %p733_p11, %p732_p0 }
 0x2d8   : > { %p730_p5 = pneg %p729_p2 }
 0x2d9   : > { %p736_p6 = por %p735_p4, %p734_p1 }
 0x2db   : > { %p737_p8 = pnand %p736_p6, %p730_p5 }
 0x2dd   : > { %740 = shalt.err (!%p737_p8)
}
 0x2de   : > { %573 = dma.vmem_to_hbm [thread:$0]  (%p899_p12), %s976_s27, 128, %s974_s28, %s380_s30  }
 0x2df PF: > { %s405_s26 = sand.u32 1, %s771_s9   ;;  %p1035_p10 = scmp.ne.s32.totalorder %s1025_s16, 0 }
 0x2e0   : > { %p1036_p13 = scmp.ge.s32.totalorder %s783_s12, 2  ;;  %s406_s19 = scalar_lea.sflag [#allocation4], %s405_s26 }
 0x2e2   : > { %p584_p3 = pnand %p1036_p13, %p1035_p10 }
 0x2e4   : > { %766 = dma.done.wait (!%p584_p3), %s406_s19, 128  }
 0x2e5   : > { %768 = vsyncadd (!%p584_p3), %s406_s19, 4294967168  ;;  %p16_p7 = scmp.ge.s32.totalorder %s864_s21, 4   ;;  %s1037_s9 = smov %s775_s10 }
 0x2e6   : > { %s1038_s10 = smov %s779_s11  ;;  %s1039_s11 = smov %s895_s8 }
 0x2e7   : > { %s1040_s12 = smov %s864_s21  ;;  %18 = sbr.rel (!%p16_p7) target bundleno = 6 (0x6), region = 77 }
 0x2ee   :  { %411 = vsyncpa [#allocation3], 1 }
 0x2ef   :  { %413 = vsyncpa [#allocation3 + $0x1], 1 }
 0x2f0   :  { %414 = vsyncpa [#allocation6], 1 }
 0x2f1   :  { %415 = vsyncpa [#allocation4], 1 }
 0x2f2   :  { %417 = vsyncpa [#allocation4 + $0x1], 1 }

</bundles_post_ra>
